<compile_context>
chip_gen: v6e
topology: v6e:2x2x1
jax: 0.10.0
libtpu: 0.0.40
codegen_flags: <defaults>
</compile_context>

<pallas_src>
import functools
from typing import Any, Dict, Optional

import jax
import jax.numpy as jnp
from jax.experimental import pallas as pl
from jax.experimental.pallas import tpu as pltpu

_LANE = 128
_SUBLANE = 8


# ----------------------------------------------------------------------------
# Pallas kernel: fused (f32 -> bf16 cast) + matmul + bias + relu
# ----------------------------------------------------------------------------
def _postproc_kernel(x_ref, w_ref, b_ref, o_ref):
    # x_ref: (TILE_B, D_in) f32   -- cast to bf16 here (VPU) instead of a
    #                                separate XLA pass over x in HBM.
    # w_ref: (D_in, TILE_N) bf16  -- streamed per N tile (resident when nj==1).
    # b_ref: (1, TILE_N) f32
    # o_ref: (TILE_B, TILE_N)     -- bf16 by default (halved writeback).
    x = x_ref[...].astype(jnp.bfloat16)
    acc = jnp.dot(x, w_ref[...], preferred_element_type=jnp.float32)
    acc = acc + b_ref[...]                          # f32 bias add (broadcast)
    o_ref[...] = jnp.maximum(acc, 0.0).astype(o_ref.dtype)


# ----------------------------------------------------------------------------
# Tiling / VMEM-budget helpers (all static, trace-time Python)
# ----------------------------------------------------------------------------
@functools.lru_cache(maxsize=None)
def _vmem_limit_bytes() -> int:
    """Generation-aware scoped-VMEM budget.

    v5e/v6e have 128 MiB physical VMEM (allow up to ~96 MiB); v7x has 64 MiB
    (allow ~48 MiB). Conservative fallback if the query is unavailable.
    """
    cap = 64 << 20  # conservative fallback = v7x physical VMEM
    try:
        info = pltpu.get_tpu_info()
        cap = int(getattr(info, "vmem_capacity_bytes", cap) or cap)
    except Exception:
        pass
    return int(min(max(cap - (16 << 20), 32 << 20), 96 << 20))


def _choose_tile_n(d_in: int, d_out: int, w_budget: int) -> int:
    """Largest multiple-of-128 divisor of D_out whose double-buffered bf16 W
    tile fits `w_budget` — keeps big weights v7x/64MiB-safe without shrinking
    the batch tile. (For typical postproc sizes this returns D_out itself.)"""
    for tn in range(d_out, _LANE - 1, -_LANE):
        if d_out % tn == 0 and 2 * (d_in * tn * 2) <= w_budget:
            return tn
    return _LANE


def _choose_tile_b(batch: int, row_bytes: int, budget: int) -> int:
    """Largest of {512, 384, 256, 128} dividing `batch` that fits `budget`,
    preferring choices that leave >= 2 grid steps so the parallel batch axis
    can shard across v7x's two TensorCores."""
    cands = [c for c in (512, 384, 256, 128) if batch % c == 0]
    for need_split in (True, False):
        for c in cands:
            if need_split and batch // c < 2:
                continue
            if c * row_bytes <= budget:
                return c
    return cands[-1] if cands else _LANE


# ----------------------------------------------------------------------------
# y = relu(x @ W + b) via a single gridded pallas_call (jit-cached per shape)
# ----------------------------------------------------------------------------
@functools.partial(jax.jit, static_argnames=("out_dtype",))
def _postproc_forward(x: jax.Array, w_bf16: jax.Array, b_row: jax.Array,
                      *, out_dtype) -> jax.Array:
    B, D_in = x.shape
    D_out = w_bf16.shape[1]
    out_dtype = jnp.dtype(out_dtype)
    out_itemsize = out_dtype.itemsize

    vmem_limit = _vmem_limit_bytes()

    # Weight tiling over D_out (nj == 1 for typical postproc weights).
    tile_n = _choose_tile_n(D_in, D_out, w_budget=vmem_limit // 3)
    w_resident = 2 * (D_in * tile_n * 2) + 2 * (tile_n * 4)      # W + bias bufs
    # Per-row cost of the double-buffered x (f32) and out tiles.
    row_bytes = 2 * (D_in * 4 + tile_n * out_itemsize)

    if B % _LANE == 0:
        tile_b = _choose_tile_b(B, row_bytes, budget=vmem_limit - w_resident)
    else:
        # Ragged batch: one full-extent block (block == array dim is allowed),
        # so there is no padded copy of x and no sliced copy of the output.
        # TODO(synk): for very large ragged batches, use a cdiv grid with a
        # masked final-tile store instead of a single block.
        tile_b = B

    nb = pl.cdiv(B, tile_b)
    nj = D_out // tile_n
    grid = (nj, nb)   # N-tile outer so a large W streams through VMEM once

    cost = pl.CostEstimate(
        flops=2 * B * D_in * D_out,
        transcendentals=0,
        bytes_accessed=(B * D_in * x.dtype.itemsize        # x read
                        + D_in * D_out * 2 + D_out * 4     # W + b read
                        + B * D_out * out_itemsize),       # y write
    )

    return pl.pallas_call(
        _postproc_kernel,
        out_shape=jax.ShapeDtypeStruct((B, D_out), out_dtype),
        grid_spec=pltpu.PrefetchScalarGridSpec(
            num_scalar_prefetch=0,
            grid=grid,
            in_specs=[
                pl.BlockSpec((tile_b, D_in), lambda j, i: (i, 0)),   # x (f32)
                pl.BlockSpec((D_in, tile_n), lambda j, i: (0, j)),   # W (bf16)
                pl.BlockSpec((1, tile_n), lambda j, i: (0, j)),      # bias (f32)
            ],
            out_specs=pl.BlockSpec((tile_b, tile_n), lambda j, i: (i, j)),
        ),
        compiler_params=pltpu.CompilerParams(
            # Both axes independent -> shardable across v7x's 2 TensorCores.
            dimension_semantics=("parallel", "parallel"),
            vmem_limit_bytes=vmem_limit,
        ),
        cost_estimate=cost,
    )(x, w_bf16, b_row)


# ----------------------------------------------------------------------------
# Python-side wrapper reproducing PipelinedPostproc's forward semantics
# ----------------------------------------------------------------------------
class NoOpStream:
    """No-op context manager standing in for a device stream context."""

    def __init__(self, stream: Optional[Any]) -> None:
        self._stream = stream

    def __enter__(self) -> "NoOpStream":
        return self

    def __exit__(self, exc_type, exc_value, traceback) -> None:
        return None


class TrainPipelineContext:
    def __init__(self, index: int = 0) -> None:
        self.index = index
        self.postproc_fwd_results: Dict[str, Any] = {}


class CallArgs:
    """Minimal CallArgs: the postproc takes the pipelined batch as its only arg."""

    def build_args_kwargs(self, batch: Any):
        return (batch,), {}


class PostprocModule:
    """The wrapped postproc module; its compute runs in the Pallas kernel."""

    def __init__(self, d_in: int, d_out: int, out_dtype=jnp.bfloat16) -> None:
        # Guard lane-density invariants up front (sub-128 output tiles would
        # fall back to masked partial stores; reject early instead).
        assert d_out % _LANE == 0, "D_out must be a multiple of 128 (lane-dense stores)"
        assert d_in % _SUBLANE == 0, "D_in must be a multiple of 8"
        # Deterministic parameter init (synthetic; no checkpoint load).
        kw, kb = jax.random.split(jax.random.PRNGKey(42))
        w_f32 = (jax.random.normal(kw, (d_in, d_out), jnp.float32)
                 * (1.0 / jnp.sqrt(d_in)))
        # MXU-native bf16 weights (f32 accumulation inside the kernel).
        self.weight_bf16 = w_f32.astype(jnp.bfloat16)
        # Bias stays f32; stored once as a (1, D_out) row for the kernel.
        self.bias = (jax.random.normal(kb, (d_out,), jnp.float32) * 0.01).astype(jnp.float32)
        self._bias_row = self.bias.reshape(1, d_out)
        # bf16 output by default: halves output writeback traffic in the
        # mem-bound regime. Pass jnp.float32 if downstream needs f32.
        self.out_dtype = jnp.dtype(out_dtype)

    def __call__(self, x: jax.Array) -> jax.Array:
        return _postproc_forward(x, self.weight_bf16, self._bias_row,
                                 out_dtype=self.out_dtype)

    def reference(self, x: jax.Array) -> jax.Array:
        """Plain-JAX reference with the same bf16-input / f32-accum numerics."""
        acc = jnp.dot(x.astype(jnp.bfloat16), self.weight_bf16,
                      preferred_element_type=jnp.float32)
        return jnp.maximum(acc + self.bias, 0.0).astype(self.out_dtype)


class PipelinedPostproc:
    """JAX port of torchrec PipelinedPostproc.forward semantics."""

    def __init__(
        self,
        postproc_module: PostprocModule,
        fqn: str,
        args: CallArgs,
        context: TrainPipelineContext,
        default_stream: Optional[Any] = None,
        dist_stream: Optional[Any] = None,
    ) -> None:
        self._postproc_module = postproc_module
        self._fqn = fqn
        self._args = args
        self._context = context
        self._default_stream = default_stream
        self._dist_stream = dist_stream
        # TODO(synk): torch.cuda stream contexts / wait_stream / record_stream
        # have no TPU/Pallas equivalent; modelled as NoOpStream.
        self._stream_context = NoOpStream

    @property
    def postproc_module(self) -> PostprocModule:
        return self._postproc_module

    @property
    def fqn(self) -> str:
        return self._fqn

    @property
    def args(self) -> CallArgs:
        return self._args

    def set_context(self, context: TrainPipelineContext) -> None:
        self._context = context

    def get_context(self) -> TrainPipelineContext:
        return self._context

    def forward(self, *input, **kwargs) -> Any:
        # Cache hit: return previously computed postproc result for this fqn.
        if self._fqn in self._context.postproc_fwd_results:
            return self._context.postproc_fwd_results[self._fqn]
        args, kw = self._args.build_args_kwargs(input[0])
        with self._stream_context(self._dist_stream):
            res = self._postproc_module(*args, **kw)
        # (stream sync + record_stream are no-ops on TPU)
        with self._stream_context(self._default_stream):
            self._context.postproc_fwd_results[self._fqn] = res
        return res

    __call__ = forward


# ----------------------------------------------------------------------------
if __name__ == "__main__":
    # Small but MXU/roofline-friendly shapes: 1024 rows -> two 512-row batch
    # tiles (>= 2 parallel grid steps), 256-lane features, one D_out tile.
    B, D_IN, D_OUT = 1024, 256, 256

    key = jax.random.PRNGKey(0)
    x = jax.random.normal(key, (B, D_IN), jnp.float32)

    postproc = PostprocModule(D_IN, D_OUT)
    ctx = TrainPipelineContext(index=0)
    wrapped = PipelinedPostproc(
        postproc_module=postproc,
        fqn="model.postproc",
        args=CallArgs(),
        context=ctx,
        default_stream=None,
        dist_stream=None,
    )

    out = wrapped(x)                       # runs the Pallas kernel (jit-cached)
    out = jax.block_until_ready(out)

    # Verify caching semantics: second call returns the cached result object.
    out2 = wrapped(x)
    assert out2 is out, "forward() should return cached result on second call"

    # Verify numerics against a plain-JAX reference with matching precision.
    ref = postproc.reference(x)
    assert out.shape == (B, D_OUT) and out.dtype == jnp.bfloat16
    ok = jnp.allclose(out.astype(jnp.float32), ref.astype(jnp.float32),
                      atol=5e-2, rtol=5e-2)
    assert bool(ok), (
        f"max abs err {jnp.max(jnp.abs(out.astype(jnp.float32) - ref.astype(jnp.float32)))}"
    )

    print("KERNEL_OK")
</pallas_src>

<mosaic_0001>
module attributes {stable_mosaic.version = 11 : i64} {
  func.func @_postproc_kernel(%arg0: i32, %arg1: i32, %arg2: memref<512x256xf32, #tpu.memory_space<vmem>>, %arg3: memref<256x256xbf16, #tpu.memory_space<vmem>>, %arg4: memref<1x256xf32, #tpu.memory_space<vmem>>, %arg5: memref<512x256xbf16, #tpu.memory_space<vmem>>) attributes {dimension_semantics = [#tpu.dimension_semantics<parallel>, #tpu.dimension_semantics<parallel>], iteration_bounds = array<i64: 1, 2>, scalar_prefetch = 0 : i64, scratch_operands = 0 : i64, tpu.core_type = #tpu.core_type<tc>, window_params = [{transform_indices = @transform_0, window_bounds = array<i64: 512, 256>}, {transform_indices = @transform_1, window_bounds = array<i64: 256, 256>}, {transform_indices = @transform_2, window_bounds = array<i64: 1, 256>}, {transform_indices = @transform_3, window_bounds = array<i64: 512, 256>}]} {
    %c0 = arith.constant 0 : index
    %c0_0 = arith.constant 0 : index
    %0 = vector.load %arg2[%c0, %c0_0] : memref<512x256xf32, #tpu.memory_space<vmem>>, vector<512x256xf32>
    %1 = arith.truncf %0 : vector<512x256xf32> to vector<512x256xbf16>
    %c0_1 = arith.constant 0 : index
    %c0_2 = arith.constant 0 : index
    %2 = vector.load %arg3[%c0_1, %c0_2] : memref<256x256xbf16, #tpu.memory_space<vmem>>, vector<256x256xbf16>
    %cst = arith.constant dense<0.000000e+00> : vector<512x256xf32>
    %3 = tpu.matmul %1, %2, %cst {dimension_numbers = #tpu.dot_dimension_numbers<[1], [0], [0], [1], [0, 0, 1, 1], [], []>} : vector<512x256xbf16>, vector<256x256xbf16>, vector<512x256xf32> -> vector<512x256xf32>
    %c0_3 = arith.constant 0 : index
    %c0_4 = arith.constant 0 : index
    %4 = vector.load %arg4[%c0_3, %c0_4] : memref<1x256xf32, #tpu.memory_space<vmem>>, vector<1x256xf32>
    %5 = vector.broadcast %4 : vector<1x256xf32> to vector<512x256xf32>
    %6 = arith.addf %3, %5 : vector<512x256xf32>
    %cst_5 = arith.constant 0.000000e+00 : f32
    %7 = vector.broadcast %cst_5 : f32 to vector<512x256xf32>
    %8 = arith.maximumf %6, %7 : vector<512x256xf32>
    %9 = arith.truncf %8 : vector<512x256xf32> to vector<512x256xbf16>
    %c0_6 = arith.constant 0 : index
    %c0_7 = arith.constant 0 : index
    %10 = vector.load %arg5[%c0_6, %c0_7] : memref<512x256xbf16, #tpu.memory_space<vmem>>, vector<512x256xbf16>
    tpu.vector_store %arg5[%c0_6, %c0_7], %9 {strides = array<i32>} : memref<512x256xbf16, #tpu.memory_space<vmem>>, vector<512x256xbf16>,
    return
  }
  func.func @transform_0(%arg0: i32, %arg1: i32) -> (i32, i32) {
    %c0_i32 = arith.constant 0 : i32
    %c0_i32_0 = arith.constant 0 : i32
    return %arg1, %c0_i32 : i32, i32
  }
  func.func @transform_1(%arg0: i32, %arg1: i32) -> (i32, i32) {
    %c0_i32 = arith.constant 0 : i32
    %c0_i32_0 = arith.constant 0 : i32
    return %c0_i32, %arg0 : i32, i32
  }
  func.func @transform_2(%arg0: i32, %arg1: i32) -> (i32, i32) {
    %c0_i32 = arith.constant 0 : i32
    %c0_i32_0 = arith.constant 0 : i32
    return %c0_i32, %arg0 : i32, i32
  }
  func.func @transform_3(%arg0: i32, %arg1: i32) -> (i32, i32) {
    %c0_i32 = arith.constant 0 : i32
    return %arg1, %arg0 : i32, i32
  }
}

</mosaic_0001>

<bundles_post_ra>
// kernel: _postproc_forward.1
= control target key start
LH: loop header
LB: loop body
LE: loop exit
PB: predicated region body
PF: predicated region fallthrough
CT: control target
= control target key end

     0   :  { %8 = vsyncpa [#allocation3], 0  ;;  %s2726_s0 = inlined_call_operand.hbm [shape: f32[1024,256], index: 0, kind: input, shape index: {}]   ;;  %s2727_s1 = inlined_call_operand.hbm [shape: bf16[256,256], index: 1, kind: input, shape index: {}]   ;;  %s2728_s2 = inlined_call_operand.vmem [shape: f32[1,256], index: 2, kind: input, shape index: {}]   ;;  %s2729_s3 = inlined_call_operand.hbm [shape: bf16[1024,256], index: 3, kind: output, shape index: {}]  }
   0x1   :  { %10 = vsyncpa [#allocation3 + $0x1], 0 }
   0x2   :  { %11 = vsyncpa [#allocation6], 0 }
   0x3   :  { %12 = vsyncpa [#allocation4], 0 }
   0x4   :  { %14 = vsyncpa [#allocation4 + $0x1], 0  ;;  %s2212_s12 = smov 0   ;;  %s2214_s13 = smov 0  }
   0x5   :  { %s2216_s14 = smov 0   ;;  %s2218_s15 = smov 0  }
   0x6   :  { %s2220_s16 = smov 0   ;;  %s2222_s17 = smov 0  }
   0x7 LB: > { %s1700_s18 = sadd.s32 4294967295, %s2181_s17   ;;  %s1701_s19 = sadd.s32 4294967294, %s2181_s17   ;;  %s2181_s17 = sphi %s2222_s17, %s20_s17   ;;  %s2177_s16 = sphi %s2220_s16, %s2747_s16   ;;  %s2173_s15 = sphi %s2218_s15, %s2746_s15   ;;  %s2169_s14 = sphi %s2216_s14, %s2745_s14   ;;  %s2165_s13 = sphi %s2214_s13, %s2744_s13   ;;  %s2161_s12 = sphi %s2212_s12, %s2743_s12  }
   0x8   : > { %p52_p0 = scmp.ne.s32.totalorder %s2165_s13, %s2161_s12  ;;  %p2246_p1 = scmp.eq.s32.totalorder %s1700_s18, 0 }
   0x9   : > { %p2250_p2 = scmp.eq.s32.totalorder %s1700_s18, 1  ;;  %p136_p3 = scmp.eq.s32.totalorder %s1701_s19, 1 }
   0xa   : > { %p2256_p4 = por %p2246_p1, %p52_p0  ;;  %p1702_p5 = scmp.ge.s32.totalorder %s2181_s17, 1 }
   0xb   : > { %p2261_p6 = por %p136_p3, %p52_p0  ;;  %p143_p7 = scmp.lt.s32.totalorder %s2181_s17, 3 }
   0xc   : > { %s2733_s22 = scalar_select %p2256_p4, 1, 0 }
   0xd   : > { %s2734_s23 = scalar_select %p2261_p6, 1, 0 }
   0xe   : > { %p2266_p8 = pnand %p1702_p5, %p143_p7  ;;  %s2183_s25 = smov [#allocation5]  }
   0xf   : > { %s158_s26 = sshll.u32 %s2183_s25, 4  ;;  %s29_s28 = sadd.s32 1, %s2177_s16  ;;  %s159_s26 = int_to_ptr.vmem [resolvable:$true] %s158_s26 }
  0x10   : > { %p1924_p9 = pneg %p2266_p8  ;;  %s2054_s29 = scalar_lea.vmem %s159_s26, 4096 }
  0x11   : > { %p2055_p13 = scmp.ne.s32.totalorder %s159_s26, %s2054_s29  ;;  %p2062_p5 = scmp.lt.s32.totalorder %s159_s26, %s159_s26 }
  0x12   : > { %p2275_p11 = pnand %p1924_p9, %p2246_p1  ;;  %p2063_p7 = scmp.lt.s32.totalorder %s2054_s29, %s2054_s29 }
  0x14   : > { %p2045_p12 = pneg %p2275_p11  ;;  %p2064_p6 = por %p2063_p7, %p2062_p5 }
  0x16   : > { %p2057_p0 = pnand %p2055_p13, %p2045_p12 }
  0x18   : > { %p2058_p3 = pneg %p2057_p0 }
  0x1a   : > { %p2065_p4 = pnand %p2064_p6, %p2058_p3 }
  0x1c   : > { %2068 = shalt.err (!%p2065_p4)
}
  0x1d   : > { %s2184_s30 = smov 128   ;;  %s2185_s4 = smov 8  }
  0x1e   : > { %1927 = dma.hbm_to_vmem [thread:$0]  (!%p2275_p11), %s2727_s1, 4096, %s159_s26, [#allocation6], %s2184_s30, %s2184_s30, %s2185_s4  }
  0x1f   : > { %p30_p6 = scmp.ge.s32.totalorder %s29_s28, 2  ;;  %s39_s7 = sadd.s32 1, %s2169_s14 }
  0x20   : > { %p46_p4 = scmp.ne.s32.totalorder %s2169_s14, %s2165_s13  ;;  %p47_p9 = scmp.eq.s32.totalorder %s2181_s17, 0 }
  0x21   : > { %s2749_s28 = smov (%p30_p6, %s29_s28), 0  ;;  %p1937_p0 = scmp.lt.s32.totalorder %s2181_s17, 2 }
  0x22   : > { %p2293_p12 = por %p47_p9, %p46_p4  ;;  %p2299_p13 = por %p2250_p2, %p46_p4 }
  0x23   : > { %s36_s10 = ssub.s32 %s2177_s16, %s2749_s28  ;;  %s180_s11 = sand.u32 1, %s2169_s14  }
  0x24   : > { %p37_p11 = scmp.eq.s32.totalorder %s36_s10, 0  ;;  %s1706_s18 = sshll.u32 %s180_s11, 10 }
  0x25   : > { %s1817_s25 = sshll.u32 %s2177_s16, 14  ;;  %s184_s30 = scalar_lea.vmem [#allocation2], %s1706_s18 }
  0x26   : > { %s2308_s19 = scalar_select %p37_p11, %s2169_s14, %s39_s7  }
  0x27   : > { %s191_s29 = scalar_lea.hbm %s2726_s0, %s1817_s25  ;;  %s192_s4 = sshll.u32 %s184_s30, 4  ;;  %s193_s4 = int_to_ptr.vmem [resolvable:$true] %s192_s4 }
  0x28   : > { %p2316_p2 = pnand %p1937_p0, %p2293_p12  ;;  %s181_s5 = scalar_lea.sflag [#allocation3], %s180_s11 }
  0x29   : > { %s2082_s6 = scalar_lea.vmem %s193_s4, 16384  ;;  %s2186_s7 = smov [#allocation2]  }
  0x2a   : > { %p2071_p3 = pneg %p2316_p2  ;;  %p2083_p5 = scmp.ne.s32.totalorder %s193_s4, %s2082_s6 }
  0x2b   : > { %s2087_s10 = sshll.u32 %s2186_s7, 4  ;;  %s2088_s10 = int_to_ptr.vmem [resolvable:$false] %s2087_s10 }
  0x2c   : > { %p2085_p7 = pnand %p2083_p5, %p2071_p3  ;;  %s2089_s25 = scalar_lea.vmem %s2088_s10, 32768 }
  0x2d   : > { %p2090_p4 = scmp.lt.s32.totalorder %s193_s4, %s2088_s10  ;;  %p2091_p9 = scmp.lt.s32.totalorder %s2089_s25, %s2082_s6 }
  0x2e   : > { %p2086_p6 = pneg %p2085_p7 }
  0x2f   : > { %p2092_p11 = por %p2091_p9, %p2090_p4 }
  0x31   : > { %p2093_p10 = pnand %p2092_p11, %p2086_p6 }
  0x33   : > { %2096 = shalt.err (!%p2093_p10)
}
  0x34   : > { %s2187_s8 = smov 256   ;;  %s2188_s18 = smov 16  }
  0x35   : > { %1931 = dma.hbm_to_vmem [thread:$0]  (!%p2316_p2), %s191_s29, 16384, %s193_s4, %s181_s5, %s2187_s8, %s2187_s8, %s2188_s18  }
  0x36   : > { %204 = sbr.rel (%p2266_p8) target bundleno = 466 (0x1d2), region = 32  ;;  %s2327_s11 = sand.u32 (!%p2266_p8), 1, %s2165_s13  }
  0x37   : > { %s1711_s26 = sshll.u32 (!%p2266_p8), %s2327_s11, 10  ;;  %s207_s27 = scalar_lea.sflag (!%p2266_p8), [#allocation3], %s2327_s11 }
  0x38   : > { %s2331_s30 = scalar_lea.vmem (!%p2266_p8), [#allocation2], %s1711_s26  ;;  %p2740_p12 = scmp.ne.s32.totalorder (!%p2266_p8), %s2733_s22, 0 }
  0x3b   : > { %2148 = dma.done.wait (%p2740_p12), %s207_s27, 16384  }
  0x3c   : > { %2150 = vsyncadd (%p2740_p12), %s207_s27, 4294950912 }
  0x3d   : > { %2152 = dma.done.wait (%p2246_p1), [#allocation6], 4096  }
  0x3e   : > { %2154 = vsyncadd (%p2246_p1), [#allocation6], 4294963200  ;;  %v1995_v0 = vld [vmem:[#allocation5 + $0x74] ss:$8 sps:$4 sm:$0xff]   ;;  %v1997_v1 = vld [vmem:[#allocation5 + $0x70] ss:$8 sps:$4 sm:$0xff]  }
  0x3f   : > { %646 = vmatprep.subr.bf16.mxu0 %v1995_v0  ;;  %1884 = vmatprep.subr.bf16.mxu1 %v1995_v0  ;;  %v1998_v2 = vld [vmem:[#allocation5 + $0x64] ss:$8 sps:$4 sm:$0xff]   ;;  %v2000_v3 = vld [vmem:[#allocation5 + $0x60] ss:$8 sps:$4 sm:$0xff]   ;;  %v2001_v4 = vld [vmem:[#allocation5 + $0x54] ss:$8 sps:$4 sm:$0xff]  }
  0x40   : > { %647 = vmatpush1.bf16.msra.mxu0 %v1997_v1  ;;  %1900 = vmatpush1.bf16.msra.mxu1 %v1997_v1  ;;  %v2003_v5 = vld [vmem:[#allocation5 + $0x50] ss:$8 sps:$4 sm:$0xff]   ;;  %v2004_v6 = vld [vmem:[#allocation5 + $0x44] ss:$8 sps:$4 sm:$0xff]   ;;  %v2006_v7 = vld [vmem:[#allocation5 + $0x40] ss:$8 sps:$4 sm:$0xff]  }
  0x41   : > { %648 = vmatprep.subr.bf16.mxu0 %v1998_v2  ;;  %1885 = vmatprep.subr.bf16.mxu1 %v1998_v2  ;;  %v2007_v8 = vld [vmem:[#allocation5 + $0x34] ss:$8 sps:$4 sm:$0xff]   ;;  %v2009_v9 = vld [vmem:[#allocation5 + $0x30] ss:$8 sps:$4 sm:$0xff]   ;;  %v2010_v10 = vld [vmem:[#allocation5 + $0x24] ss:$8 sps:$4 sm:$0xff]  }
  0x42   : > { %v2012_v11 = vld [vmem:[#allocation5 + $0x20] ss:$8 sps:$4 sm:$0xff]   ;;  %v2013_v12 = vld [vmem:[#allocation5 + $0x14] ss:$8 sps:$4 sm:$0xff]   ;;  %v2015_v18 = vld [vmem:[#allocation5 + $0x10] ss:$8 sps:$4 sm:$0xff]  }
  0x43   : > { %v251_v13 = vld [vmem:[%s2331_s30 + $0x8] sm:$0xff]  ;;  %v253_v14 = vld [vmem:[%s2331_s30 + $0x18] sm:$0xff]  ;;  %v250_v38 = vld [vmem:[%s2331_s30] sm:$0xff]  ;;  %s1713_s24 = sshll.u32 %s2327_s11, 9  ;;  %s1883_s4 = sshll.u32 %s2173_s15, 13 }
  0x44   : > { %649 = vmatpush1.bf16.msra.mxu0 %v2000_v3  ;;  %1901 = vmatpush1.bf16.msra.mxu1 %v2000_v3  ;;  %v379_v15 = vpack.c.bf16 %v253_v14, %v251_v13  ;;  %v315_v16 = vld [vmem:[%s2331_s30 + $0x208] sm:$0xff]  ;;  %v317_v17 = vld [vmem:[%s2331_s30 + $0x218] sm:$0xff]  ;;  %v252_v39 = vld [vmem:[%s2331_s30 + $0x10] sm:$0xff]  ;;  %s2485_s29 = scalar_lea.vmem [#allocation7], %s1713_s24  ;;  %s2674_s7 = scalar_lea.hbm %s2729_s3, %s1883_s4 }
  0x45   : > { %650 = vmatprep.subr.bf16.mxu0 %v2001_v4  ;;  %1886 = vmatprep.subr.bf16.mxu1 %v2001_v4  ;;  %v411_v19 = vpack.c.bf16 %v317_v17, %v315_v16  ;;  %v2016_v20 = vld [vmem:[#allocation5 + $0x4] ss:$8 sps:$4 sm:$0xff]   ;;  %v2018_v21 = vld [vmem:[#allocation5] ss:$8 sps:$4 sm:$0xff]   ;;  %v2019_v22 = vld [vmem:[#allocation5 + $0xf4] ss:$8 sps:$4 sm:$0xff]   ;;  %v378_v46 = vpack.c.bf16 %v252_v39, %v250_v38 }
  0x46   : > { %678 = vmatprep.mubr.bf16.mxu0 %v379_v15  ;;  %v2021_v23 = vld [vmem:[#allocation5 + $0xf0] ss:$8 sps:$4 sm:$0xff]   ;;  %v2022_v24 = vld [vmem:[#allocation5 + $0xe4] ss:$8 sps:$4 sm:$0xff]   ;;  %v2024_v25 = vld [vmem:[#allocation5 + $0xe0] ss:$8 sps:$4 sm:$0xff]  }
  0x47   : > { %838 = vmatprep.mubr.bf16.mxu1 %v411_v19  ;;  %v2025_v26 = vld [vmem:[#allocation5 + $0xd4] ss:$8 sps:$4 sm:$0xff]   ;;  %v2027_v27 = vld [vmem:[#allocation5 + $0xd0] ss:$8 sps:$4 sm:$0xff]   ;;  %v2028_v28 = vld [vmem:[#allocation5 + $0xc4] ss:$8 sps:$4 sm:$0xff]  }
  0x48   : > { %651 = vmatpush1.bf16.msra.mxu0 %v2003_v5  ;;  %1902 = vmatpush1.bf16.msra.mxu1 %v2003_v5  ;;  %v2030_v29 = vld [vmem:[#allocation5 + $0xc0] ss:$8 sps:$4 sm:$0xff]   ;;  %v2031_v30 = vld [vmem:[#allocation5 + $0xb4] ss:$8 sps:$4 sm:$0xff]   ;;  %v2033_v31 = vld [vmem:[#allocation5 + $0xb0] ss:$8 sps:$4 sm:$0xff]  }
  0x49   : > { %652 = vmatprep.subr.bf16.mxu0 %v2004_v6  ;;  %1887 = vmatprep.subr.bf16.mxu1 %v2004_v6  ;;  %v2034_v32 = vld [vmem:[#allocation5 + $0xa4] ss:$8 sps:$4 sm:$0xff]   ;;  %v2036_v33 = vld [vmem:[#allocation5 + $0xa0] ss:$8 sps:$4 sm:$0xff]   ;;  %v2037_v34 = vld [vmem:[#allocation5 + $0x94] ss:$8 sps:$4 sm:$0xff]  }
  0x4a   : > { %v2039_v35 = vld [vmem:[#allocation5 + $0x90] ss:$8 sps:$4 sm:$0xff]   ;;  %v2040_v36 = vld [vmem:[#allocation5 + $0x84] ss:$8 sps:$4 sm:$0xff]   ;;  %v2042_v37 = vld [vmem:[#allocation5 + $0x80] ss:$8 sps:$4 sm:$0xff]  }
  0x4b   : > { %v314_v40 = vld [vmem:[%s2331_s30 + $0x200] sm:$0xff]  ;;  %v316_v41 = vld [vmem:[%s2331_s30 + $0x210] sm:$0xff]  ;;  %v255_v42 = vld [vmem:[%s2331_s30 + $0x28] sm:$0xff]  ;;  %s1592_s21 = sshll.u32 %s2485_s29, 4  ;;  %s1576_s15 = scalar_lea.sflag [#allocation4], %s2327_s11  ;;  %s2676_s21 = int_to_ptr.vmem [resolvable:$true] %s1592_s21 }
  0x4c   : > { %653 = vmatpush1.bf16.msra.mxu0 %v2006_v7  ;;  %1903 = vmatpush1.bf16.msra.mxu1 %v2006_v7  ;;  %v257_v43 = vld [vmem:[%s2331_s30 + $0x38] sm:$0xff]  ;;  %v319_v44 = vld [vmem:[%s2331_s30 + $0x228] sm:$0xff]  ;;  %v410_v47 = vpack.c.bf16 %v316_v41, %v314_v40  ;;  %v254_v50 = vld [vmem:[%s2331_s30 + $0x20] sm:$0xff]  ;;  %s2097_s10 = scalar_lea.vmem %s2676_s21, 8192  ;;  %s2189_s25 = smov [#allocation7]  }
  0x4d   : > { %654 = vmatprep.subr.bf16.mxu0 %v2007_v8  ;;  %1888 = vmatprep.subr.bf16.mxu1 %v2007_v8  ;;  %v321_v45 = vld [vmem:[%s2331_s30 + $0x238] sm:$0xff]  ;;  %v381_v48 = vpack.c.bf16 %v257_v43, %v255_v42  ;;  %v256_v51 = vld [vmem:[%s2331_s30 + $0x30] sm:$0xff]  ;;  %v318_v52 = vld [vmem:[%s2331_s30 + $0x220] sm:$0xff]  ;;  %p2098_p1 = scmp.ne.s32.totalorder %s2676_s21, %s2097_s10  ;;  %s2101_s8 = sshll.u32 %s2189_s25, 4  ;;  %s2102_s8 = int_to_ptr.vmem [resolvable:$false] %s2101_s8 }
  0x4e   : > { %v413_v49 = vpack.c.bf16 %v321_v45, %v319_v44  ;;  %v320_v53 = vld [vmem:[%s2331_s30 + $0x230] sm:$0xff]  ;;  %v259_v54 = vld [vmem:[%s2331_s30 + $0x48] sm:$0xff]  ;;  %v261_v55 = vld [vmem:[%s2331_s30 + $0x58] sm:$0xff]  ;;  %v380_v58 = vpack.c.bf16 %v256_v51, %v254_v50  ;;  %s2103_s18 = scalar_lea.vmem %s2102_s8, 16384  ;;  %p2104_p0 = scmp.lt.s32.totalorder %s2676_s21, %s2102_s8 }
  0x4f   : > { %v323_v56 = vld [vmem:[%s2331_s30 + $0x248] sm:$0xff]  ;;  %v325_v57 = vld [vmem:[%s2331_s30 + $0x258] sm:$0xff]  ;;  %v412_v59 = vpack.c.bf16 %v320_v53, %v318_v52  ;;  %v383_v60 = vpack.c.bf16 %v261_v55, %v259_v54  ;;  %v258_v62 = vld [vmem:[%s2331_s30 + $0x40] sm:$0xff]  ;;  %p2099_p8 = pnand %p2098_p1, %p2299_p13  ;;  %p2105_p2 = scmp.lt.s32.totalorder %s2103_s18, %s2097_s10 }
  0x50   : > { %655 = vmatpush1.bf16.msra.mxu0 %v2009_v9  ;;  %1904 = vmatpush1.bf16.msra.mxu1 %v2009_v9  ;;  %v415_v61 = vpack.c.bf16 %v325_v57, %v323_v56  ;;  %v260_v63 = vld [vmem:[%s2331_s30 + $0x50] sm:$0xff]  ;;  %v322_v0 = vld [vmem:[%s2331_s30 + $0x240] sm:$0xff]  ;;  %v263_v2 = vld [vmem:[%s2331_s30 + $0x68] sm:$0xff] }
  0x51   : > { %656 = vmatprep.subr.bf16.mxu0 %v2010_v10  ;;  %1889 = vmatprep.subr.bf16.mxu1 %v2010_v10  ;;  %v324_v1 = vld [vmem:[%s2331_s30 + $0x250] sm:$0xff]  ;;  %v265_v3 = vld [vmem:[%s2331_s30 + $0x78] sm:$0xff]  ;;  %v327_v4 = vld [vmem:[%s2331_s30 + $0x268] sm:$0xff]  ;;  %v382_v6 = vpack.c.bf16 %v260_v63, %v258_v62  ;;  %p2100_p10 = pneg %p2099_p8  ;;  %p2106_p3 = por %p2105_p2, %p2104_p0 }
  0x52   : > { %v329_v5 = vld [vmem:[%s2331_s30 + $0x278] sm:$0xff]  ;;  %v414_v7 = vpack.c.bf16 %v324_v1, %v322_v0  ;;  %v385_v8 = vpack.c.bf16 %v265_v3, %v263_v2  ;;  %v262_v10 = vld [vmem:[%s2331_s30 + $0x60] sm:$0xff]  ;;  %v328_v13 = vld [vmem:[%s2331_s30 + $0x270] sm:$0xff] }
  0x53   : > { %v417_v9 = vpack.c.bf16 %v329_v5, %v327_v4  ;;  %v267_v14 = vld [vmem:[%s2331_s30 + $0x88] sm:$0xff]  ;;  %v269_v15 = vld [vmem:[%s2331_s30 + $0x98] sm:$0xff]  ;;  %p2107_p5 = pnand %p2106_p3, %p2100_p10 }
  0x54   : > { %657 = vmatpush1.bf16.msra.mxu0 %v2012_v11  ;;  %1905 = vmatpush1.bf16.msra.mxu1 %v2012_v11  ;;  %v264_v11 = vld [vmem:[%s2331_s30 + $0x70] sm:$0xff]  ;;  %v331_v16 = vld [vmem:[%s2331_s30 + $0x288] sm:$0xff]  ;;  %v333_v17 = vld [vmem:[%s2331_s30 + $0x298] sm:$0xff] }
  0x55   : > { %658 = vmatprep.subr.bf16.mxu0 %v2013_v12  ;;  %1890 = vmatprep.subr.bf16.mxu1 %v2013_v12  ;;  %v326_v12 = vld [vmem:[%s2331_s30 + $0x260] sm:$0xff]  ;;  %v275_v38 = vld [vmem:[%s2331_s30 + $0xc8] sm:$0xff]  ;;  %v277_v39 = vld [vmem:[%s2331_s30 + $0xd8] sm:$0xff] }
  0x56   : > { %v416_v19 = vpack.c.bf16 %v328_v13, %v326_v12  ;;  %v339_v40 = vld [vmem:[%s2331_s30 + $0x2c8] sm:$0xff]  ;;  %v341_v41 = vld [vmem:[%s2331_s30 + $0x2d8] sm:$0xff]  ;;  %v391_v44 = vpack.c.bf16 %v277_v39, %v275_v38 }
  0x57   : > { %v423_v45 = vpack.c.bf16 %v341_v41, %v339_v40  ;;  %v279_v50 = vld [vmem:[%s2331_s30 + $0xe8] sm:$0xff]  ;;  %v281_v51 = vld [vmem:[%s2331_s30 + $0xf8] sm:$0xff] }
  0x58   : > { %659 = vmatpush1.bf16.msra.mxu0 %v2015_v18  ;;  %1906 = vmatpush1.bf16.msra.mxu1 %v2015_v18  ;;  %v384_v18 = vpack.c.bf16 %v264_v11, %v262_v10  ;;  %v343_v52 = vld [vmem:[%s2331_s30 + $0x2e8] sm:$0xff]  ;;  %v345_v53 = vld [vmem:[%s2331_s30 + $0x2f8] sm:$0xff]  ;;  %v393_v56 = vpack.c.bf16 %v281_v51, %v279_v50 }
  0x59   : > { %660 = vmatprep.subr.bf16.mxu0 %v2016_v20  ;;  %1891 = vmatprep.subr.bf16.mxu1 %v2016_v20  ;;  %v387_v20 = vpack.c.bf16 %v269_v15, %v267_v14  ;;  %v425_v57 = vpack.c.bf16 %v345_v53, %v343_v52  ;;  %v283_v62 = vld [vmem:[%s2331_s30 + $0x108] sm:$0xff]  ;;  %v285_v63 = vld [vmem:[%s2331_s30 + $0x118] sm:$0xff] }
  0x5a   : > { %v347_v0 = vld [vmem:[%s2331_s30 + $0x308] sm:$0xff]  ;;  %v349_v1 = vld [vmem:[%s2331_s30 + $0x318] sm:$0xff]  ;;  %v395_v4 = vpack.c.bf16 %v285_v63, %v283_v62 }
  0x5b   : > { %v427_v5 = vpack.c.bf16 %v349_v1, %v347_v0  ;;  %v287_v10 = vld [vmem:[%s2331_s30 + $0x128] sm:$0xff]  ;;  %v289_v11 = vld [vmem:[%s2331_s30 + $0x138] sm:$0xff] }
  0x5c   : > { %661 = vmatpush1.bf16.msra.mxu0 %v2018_v21  ;;  %1907 = vmatpush1.bf16.msra.mxu1 %v2018_v21  ;;  %v419_v21 = vpack.c.bf16 %v333_v17, %v331_v16  ;;  %v351_v12 = vld [vmem:[%s2331_s30 + $0x328] sm:$0xff]  ;;  %v353_v13 = vld [vmem:[%s2331_s30 + $0x338] sm:$0xff]  ;;  %v397_v16 = vpack.c.bf16 %v289_v11, %v287_v10 }
  0x5d   : > { %662 = vmatprep.subr.bf16.mxu0 %v2019_v22  ;;  %1892 = vmatprep.subr.bf16.mxu1 %v2019_v22  ;;  %v266_v22 = vld [vmem:[%s2331_s30 + $0x80] sm:$0xff]  ;;  %v429_v17 = vpack.c.bf16 %v353_v13, %v351_v12 }
  0x60   : > { %663 = vmatpush2.bf16.msra.mxu0 %v2021_v23  ;;  %1908 = vmatpush2.bf16.msra.mxu1 %v2021_v23  ;;  %v268_v23 = vld [vmem:[%s2331_s30 + $0x90] sm:$0xff] }
  0x61   : > { %664 = vmatprep.subr.bf16.mxu0 %v2022_v24  ;;  %1893 = vmatprep.subr.bf16.mxu1 %v2022_v24  ;;  %v330_v24 = vld [vmem:[%s2331_s30 + $0x280] sm:$0xff] }
  0x64   : > { %665 = vmatpush2.bf16.msra.mxu0 %v2024_v25  ;;  %1909 = vmatpush2.bf16.msra.mxu1 %v2024_v25  ;;  %v332_v25 = vld [vmem:[%s2331_s30 + $0x290] sm:$0xff] }
  0x65   : > { %666 = vmatprep.subr.bf16.mxu0 %v2025_v26  ;;  %1894 = vmatprep.subr.bf16.mxu1 %v2025_v26  ;;  %v271_v26 = vld [vmem:[%s2331_s30 + $0xa8] sm:$0xff] }
  0x68   : > { %667 = vmatpush2.bf16.msra.mxu0 %v2027_v27  ;;  %1910 = vmatpush2.bf16.msra.mxu1 %v2027_v27  ;;  %v273_v27 = vld [vmem:[%s2331_s30 + $0xb8] sm:$0xff] }
  0x69   : > { %668 = vmatprep.subr.bf16.mxu0 %v2028_v28  ;;  %1895 = vmatprep.subr.bf16.mxu1 %v2028_v28  ;;  %v335_v28 = vld [vmem:[%s2331_s30 + $0x2a8] sm:$0xff] }
  0x6c   : > { %669 = vmatpush2.bf16.msra.mxu0 %v2030_v29  ;;  %1911 = vmatpush2.bf16.msra.mxu1 %v2030_v29  ;;  %v337_v29 = vld [vmem:[%s2331_s30 + $0x2b8] sm:$0xff] }
  0x6d   : > { %670 = vmatprep.subr.bf16.mxu0 %v2031_v30  ;;  %1896 = vmatprep.subr.bf16.mxu1 %v2031_v30  ;;  %v386_v30 = vpack.c.bf16 %v268_v23, %v266_v22  ;;  %v291_v22 = vld [vmem:[%s2331_s30 + $0x148] sm:$0xff]  ;;  %v293_v23 = vld [vmem:[%s2331_s30 + $0x158] sm:$0xff] }
  0x70   : > { %671 = vmatpush2.bf16.msra.mxu0 %v2033_v31  ;;  %1912 = vmatpush2.bf16.msra.mxu1 %v2033_v31  ;;  %v418_v31 = vpack.c.bf16 %v332_v25, %v330_v24  ;;  %v355_v24 = vld [vmem:[%s2331_s30 + $0x348] sm:$0xff]  ;;  %v357_v25 = vld [vmem:[%s2331_s30 + $0x358] sm:$0xff] }
  0x71   : > { %672 = vmatprep.subr.bf16.mxu0 %v2034_v32  ;;  %1897 = vmatprep.subr.bf16.mxu1 %v2034_v32  ;;  %v389_v32 = vpack.c.bf16 %v273_v27, %v271_v26 }
  0x74   : > { %673 = vmatpush2.bf16.msra.mxu0 %v2036_v33  ;;  %1913 = vmatpush2.bf16.msra.mxu1 %v2036_v33  ;;  %v421_v33 = vpack.c.bf16 %v337_v29, %v335_v28  ;;  %v399_v28 = vpack.c.bf16 %v293_v23, %v291_v22  ;;  %v431_v29 = vpack.c.bf16 %v357_v25, %v355_v24 }
  0x75   : > { %674 = vmatprep.subr.bf16.mxu0 %v2037_v34  ;;  %1898 = vmatprep.subr.bf16.mxu1 %v2037_v34  ;;  %v270_v34 = vld [vmem:[%s2331_s30 + $0xa0] sm:$0xff] }
  0x78   : > { %675 = vmatpush2.bf16.msra.mxu0 %v2039_v35  ;;  %1914 = vmatpush2.bf16.msra.mxu1 %v2039_v35  ;;  %v272_v35 = vld [vmem:[%s2331_s30 + $0xb0] sm:$0xff] }
  0x79   : > { %676 = vmatprep.subr.bf16.mxu0 %v2040_v36  ;;  %1899 = vmatprep.subr.bf16.mxu1 %v2040_v36  ;;  %v334_v36 = vld [vmem:[%s2331_s30 + $0x2a0] sm:$0xff]  ;;  %v388_v42 = vpack.c.bf16 %v272_v35, %v270_v34  ;;  %v295_v34 = vld [vmem:[%s2331_s30 + $0x168] sm:$0xff]  ;;  %v297_v35 = vld [vmem:[%s2331_s30 + $0x178] sm:$0xff] }
  0x7a   : > { %v401_v40 = vpack.c.bf16 %v297_v35, %v295_v34  ;;  %v474_v35 = vld [vmem:[%s2728_s2] sm:$0x3] }
  0x7c   : > { %677 = vmatpush2.bf16.msra.mxu0 %v2042_v37  ;;  %1915 = vmatpush2.bf16.msra.mxu1 %v2042_v37  ;;  %v336_v37 = vld [vmem:[%s2331_s30 + $0x2b0] sm:$0xff] }
  0x7d   : > { %v420_v43 = vpack.c.bf16 %v336_v37, %v334_v36  ;;  %v359_v36 = vld [vmem:[%s2331_s30 + $0x368] sm:$0xff]  ;;  %v361_v37 = vld [vmem:[%s2331_s30 + $0x378] sm:$0xff] }
  0x7e   : > { %v433_v41 = vpack.c.bf16 %v361_v37, %v359_v36 }
  0x7f   : > { %679 = vmatmul.mubr.bf16.vlgmr.msra.gmra.mxu0 %v378_v46  ;;  %839 = vmatmul.mubr.bf16.vlgmr.msra.gmra.mxu1 %v410_v47  ;;  %v274_v46 = vld [vmem:[%s2331_s30 + $0xc0] sm:$0xff]  ;;  %v276_v47 = vld [vmem:[%s2331_s30 + $0xd0] sm:$0xff] }
  0x80   : > { %688 = vmatprep.mubr.bf16.mxu0 %v381_v48  ;;  %848 = vmatprep.mubr.bf16.mxu1 %v413_v49  ;;  %v338_v48 = vld [vmem:[%s2331_s30 + $0x2c0] sm:$0xff]  ;;  %v340_v49 = vld [vmem:[%s2331_s30 + $0x2d0] sm:$0xff]  ;;  %v390_v54 = vpack.c.bf16 %v276_v47, %v274_v46  ;;  %v299_v46 = vld [vmem:[%s2331_s30 + $0x188] sm:$0xff] }
  0x81   : > { %v422_v55 = vpack.c.bf16 %v340_v49, %v338_v48  ;;  %v301_v47 = vld [vmem:[%s2331_s30 + $0x198] sm:$0xff]  ;;  %v363_v48 = vld [vmem:[%s2331_s30 + $0x388] sm:$0xff] }
  0x82   : > { %v365_v49 = vld [vmem:[%s2331_s30 + $0x398] sm:$0xff]  ;;  %v403_v52 = vpack.c.bf16 %v301_v47, %v299_v46 }
  0x83   : > { %v435_v53 = vpack.c.bf16 %v365_v49, %v363_v48 }
  0x87   : > { %689 = vmatmul.mubr.bf16.gmra.mxu0 %v380_v58  ;;  %849 = vmatmul.mubr.bf16.gmra.mxu1 %v412_v59  ;;  %v278_v58 = vld [vmem:[%s2331_s30 + $0xe0] sm:$0xff]  ;;  %v280_v59 = vld [vmem:[%s2331_s30 + $0xf0] sm:$0xff] }
  0x88   : > { %698 = vmatprep.mubr.bf16.mxu0 %v383_v60  ;;  %858 = vmatprep.mubr.bf16.mxu1 %v415_v61  ;;  %v342_v60 = vld [vmem:[%s2331_s30 + $0x2e0] sm:$0xff]  ;;  %v344_v61 = vld [vmem:[%s2331_s30 + $0x2f0] sm:$0xff]  ;;  %v392_v2 = vpack.c.bf16 %v280_v59, %v278_v58  ;;  %v303_v58 = vld [vmem:[%s2331_s30 + $0x1a8] sm:$0xff] }
  0x89   : > { %v424_v3 = vpack.c.bf16 %v344_v61, %v342_v60  ;;  %v305_v59 = vld [vmem:[%s2331_s30 + $0x1b8] sm:$0xff]  ;;  %v367_v60 = vld [vmem:[%s2331_s30 + $0x3a8] sm:$0xff] }
  0x8a   : > { %v369_v61 = vld [vmem:[%s2331_s30 + $0x3b8] sm:$0xff]  ;;  %v405_v0 = vpack.c.bf16 %v305_v59, %v303_v58 }
  0x8b   : > { %v437_v1 = vpack.c.bf16 %v369_v61, %v367_v60 }
  0x8f   : > { %699 = vmatmul.mubr.bf16.gmra.mxu0 %v382_v6  ;;  %859 = vmatmul.mubr.bf16.gmra.mxu1 %v414_v7  ;;  %v282_v6 = vld [vmem:[%s2331_s30 + $0x100] sm:$0xff]  ;;  %v284_v7 = vld [vmem:[%s2331_s30 + $0x110] sm:$0xff] }
  0x90   : > { %708 = vmatprep.mubr.bf16.mxu0 %v385_v8  ;;  %868 = vmatprep.mubr.bf16.mxu1 %v417_v9  ;;  %v346_v8 = vld [vmem:[%s2331_s30 + $0x300] sm:$0xff]  ;;  %v348_v9 = vld [vmem:[%s2331_s30 + $0x310] sm:$0xff]  ;;  %v394_v14 = vpack.c.bf16 %v284_v7, %v282_v6  ;;  %v307_v6 = vld [vmem:[%s2331_s30 + $0x1c8] sm:$0xff] }
  0x91   : > { %v426_v15 = vpack.c.bf16 %v348_v9, %v346_v8  ;;  %v309_v7 = vld [vmem:[%s2331_s30 + $0x1d8] sm:$0xff]  ;;  %v371_v8 = vld [vmem:[%s2331_s30 + $0x3c8] sm:$0xff] }
  0x92   : > { %v373_v9 = vld [vmem:[%s2331_s30 + $0x3d8] sm:$0xff]  ;;  %v407_v12 = vpack.c.bf16 %v309_v7, %v307_v6 }
  0x93   : > { %v439_v13 = vpack.c.bf16 %v373_v9, %v371_v8 }
  0x97   : > { %709 = vmatmul.mubr.bf16.gmra.mxu0 %v384_v18  ;;  %869 = vmatmul.mubr.bf16.gmra.mxu1 %v416_v19  ;;  %v286_v18 = vld [vmem:[%s2331_s30 + $0x120] sm:$0xff]  ;;  %v288_v19 = vld [vmem:[%s2331_s30 + $0x130] sm:$0xff] }
  0x98   : > { %718 = vmatprep.mubr.bf16.mxu0 %v387_v20  ;;  %878 = vmatprep.mubr.bf16.mxu1 %v419_v21  ;;  %v350_v20 = vld [vmem:[%s2331_s30 + $0x320] sm:$0xff]  ;;  %v352_v21 = vld [vmem:[%s2331_s30 + $0x330] sm:$0xff]  ;;  %v396_v26 = vpack.c.bf16 %v288_v19, %v286_v18  ;;  %v311_v18 = vld [vmem:[%s2331_s30 + $0x1e8] sm:$0xff] }
  0x99   : > { %v428_v27 = vpack.c.bf16 %v352_v21, %v350_v20  ;;  %v313_v19 = vld [vmem:[%s2331_s30 + $0x1f8] sm:$0xff]  ;;  %v375_v20 = vld [vmem:[%s2331_s30 + $0x3e8] sm:$0xff] }
  0x9a   : > { %v377_v21 = vld [vmem:[%s2331_s30 + $0x3f8] sm:$0xff]  ;;  %v409_v24 = vpack.c.bf16 %v313_v19, %v311_v18 }
  0x9b   : > { %v441_v25 = vpack.c.bf16 %v377_v21, %v375_v20 }
  0x9f   : > { %719 = vmatmul.mubr.bf16.gmra.mxu0 %v386_v30  ;;  %879 = vmatmul.mubr.bf16.gmra.mxu1 %v418_v31  ;;  %v290_v30 = vld [vmem:[%s2331_s30 + $0x140] sm:$0xff]  ;;  %v292_v31 = vld [vmem:[%s2331_s30 + $0x150] sm:$0xff] }
  0xa0   : > { %728 = vmatprep.mubr.bf16.mxu0 %v389_v32  ;;  %888 = vmatprep.mubr.bf16.mxu1 %v421_v33  ;;  %v354_v32 = vld [vmem:[%s2331_s30 + $0x340] sm:$0xff]  ;;  %v356_v33 = vld [vmem:[%s2331_s30 + $0x350] sm:$0xff]  ;;  %v398_v38 = vpack.c.bf16 %v292_v31, %v290_v30 }
  0xa1   : > { %v430_v39 = vpack.c.bf16 %v356_v33, %v354_v32  ;;  %v476_v32 = vlaneseq }
  0xa3   : > { %v477_v33 = vshrl.u32 %v476_v32, 7 }
  0xa5   : > { %v478_v34 = vsub.s32 0, %v477_v33  ;;  %v482_v36 = vsub.s32 1, %v477_v33 }
  0xa7   : > { %729 = vmatmul.mubr.bf16.gmra.mxu0 %v388_v42  ;;  %889 = vmatmul.mubr.bf16.gmra.mxu1 %v420_v43  ;;  %v294_v42 = vld [vmem:[%s2331_s30 + $0x160] sm:$0xff]  ;;  %v296_v43 = vld [vmem:[%s2331_s30 + $0x170] sm:$0xff]  ;;  %v2472_v37 = vrot.slane %v474_v35, %v478_v34 }
  0xa8   : > { %738 = vmatprep.mubr.bf16.mxu0 %v391_v44  ;;  %898 = vmatprep.mubr.bf16.mxu1 %v423_v45  ;;  %v358_v44 = vld [vmem:[%s2331_s30 + $0x360] sm:$0xff]  ;;  %v360_v45 = vld [vmem:[%s2331_s30 + $0x370] sm:$0xff]  ;;  %v400_v50 = vpack.c.bf16 %v296_v43, %v294_v42 }
  0xa9   : > { %v432_v51 = vpack.c.bf16 %v360_v45, %v358_v44 }
  0xaf   : > { %739 = vmatmul.mubr.bf16.gmra.mxu0 %v390_v54  ;;  %899 = vmatmul.mubr.bf16.gmra.mxu1 %v422_v55  ;;  %v298_v54 = vld [vmem:[%s2331_s30 + $0x180] sm:$0xff]  ;;  %v300_v55 = vld [vmem:[%s2331_s30 + $0x190] sm:$0xff] }
  0xb0   : > { %748 = vmatprep.mubr.bf16.mxu0 %v393_v56  ;;  %908 = vmatprep.mubr.bf16.mxu1 %v425_v57  ;;  %v362_v56 = vld [vmem:[%s2331_s30 + $0x380] sm:$0xff]  ;;  %v364_v57 = vld [vmem:[%s2331_s30 + $0x390] sm:$0xff]  ;;  %v402_v62 = vpack.c.bf16 %v300_v55, %v298_v54 }
  0xb1   : > { %v434_v63 = vpack.c.bf16 %v364_v57, %v362_v56 }
  0xb7   : > { %749 = vmatmul.mubr.bf16.gmra.mxu0 %v392_v2  ;;  %909 = vmatmul.mubr.bf16.gmra.mxu1 %v424_v3  ;;  %v302_v2 = vld [vmem:[%s2331_s30 + $0x1a0] sm:$0xff]  ;;  %v304_v3 = vld [vmem:[%s2331_s30 + $0x1b0] sm:$0xff] }
  0xb8   : > { %758 = vmatprep.mubr.bf16.mxu0 %v395_v4  ;;  %918 = vmatprep.mubr.bf16.mxu1 %v427_v5  ;;  %v366_v4 = vld [vmem:[%s2331_s30 + $0x3a0] sm:$0xff]  ;;  %v368_v5 = vld [vmem:[%s2331_s30 + $0x3b0] sm:$0xff]  ;;  %v404_v10 = vpack.c.bf16 %v304_v3, %v302_v2 }
  0xb9   : > { %v436_v11 = vpack.c.bf16 %v368_v5, %v366_v4 }
  0xbf   : > { %759 = vmatmul.mubr.bf16.gmra.mxu0 %v394_v14  ;;  %919 = vmatmul.mubr.bf16.gmra.mxu1 %v426_v15  ;;  %v306_v14 = vld [vmem:[%s2331_s30 + $0x1c0] sm:$0xff]  ;;  %v308_v15 = vld [vmem:[%s2331_s30 + $0x1d0] sm:$0xff] }
  0xc0   : > { %768 = vmatprep.mubr.bf16.mxu0 %v397_v16  ;;  %928 = vmatprep.mubr.bf16.mxu1 %v429_v17  ;;  %v370_v16 = vld [vmem:[%s2331_s30 + $0x3c0] sm:$0xff]  ;;  %v372_v17 = vld [vmem:[%s2331_s30 + $0x3d0] sm:$0xff]  ;;  %v406_v22 = vpack.c.bf16 %v308_v15, %v306_v14 }
  0xc1   : > { %v438_v23 = vpack.c.bf16 %v372_v17, %v370_v16 }
  0xc7   : > { %769 = vmatmul.mubr.bf16.gmra.mxu0 %v396_v26  ;;  %929 = vmatmul.mubr.bf16.gmra.mxu1 %v428_v27  ;;  %v310_v26 = vld [vmem:[%s2331_s30 + $0x1e0] sm:$0xff]  ;;  %v312_v27 = vld [vmem:[%s2331_s30 + $0x1f0] sm:$0xff] }
  0xc8   : > { %778 = vmatprep.mubr.bf16.mxu0 %v399_v28  ;;  %938 = vmatprep.mubr.bf16.mxu1 %v431_v29  ;;  %v374_v28 = vld [vmem:[%s2331_s30 + $0x3e0] sm:$0xff]  ;;  %v376_v29 = vld [vmem:[%s2331_s30 + $0x3f0] sm:$0xff]  ;;  %v408_v30 = vpack.c.bf16 %v312_v27, %v310_v26 }
  0xc9   : > { %v440_v31 = vpack.c.bf16 %v376_v29, %v374_v28 }
  0xcf   : > { %779 = vmatmul.mubr.bf16.gmra.mxu0 %v398_v38  ;;  %939 = vmatmul.mubr.bf16.gmra.mxu1 %v430_v39  ;;  %v2474_v38 = vrot.slane %v474_v35, %v482_v36 }
  0xd0   : > { %788 = vmatprep.mubr.bf16.mxu0 %v401_v40  ;;  %948 = vmatprep.mubr.bf16.mxu1 %v433_v41 }
  0xd7   : > { %789 = vmatmul.mubr.bf16.gmra.mxu0 %v400_v50  ;;  %949 = vmatmul.mubr.bf16.gmra.mxu1 %v432_v51 }
  0xd8   : > { %798 = vmatprep.mubr.bf16.mxu0 %v403_v52  ;;  %958 = vmatprep.mubr.bf16.mxu1 %v435_v53 }
  0xdf   : > { %799 = vmatmul.mubr.bf16.gmra.mxu0 %v402_v62  ;;  %959 = vmatmul.mubr.bf16.gmra.mxu1 %v434_v63 }
  0xe0   : > { %808 = vmatprep.mubr.bf16.mxu0 %v405_v0  ;;  %968 = vmatprep.mubr.bf16.mxu1 %v437_v1 }
  0xe7   : > { %809 = vmatmul.mubr.bf16.gmra.mxu0 %v404_v10  ;;  %969 = vmatmul.mubr.bf16.gmra.mxu1 %v436_v11 }
  0xe8   : > { %818 = vmatprep.mubr.bf16.mxu0 %v407_v12  ;;  %978 = vmatprep.mubr.bf16.mxu1 %v439_v13 }
  0xef   : > { %819 = vmatmul.mubr.bf16.gmra.mxu0 %v406_v22  ;;  %979 = vmatmul.mubr.bf16.gmra.mxu1 %v438_v23 }
  0xf0   : > { %828 = vmatprep.mubr.bf16.mxu0 %v409_v24  ;;  %988 = vmatprep.mubr.bf16.mxu1 %v441_v25 }
  0xf7   : > { %829 = vmatmul.mubr.bf16.gmra.mxu0 %v408_v30  ;;  %989 = vmatmul.mubr.bf16.gmra.mxu1 %v440_v31 }
 0x13f   : > { %v680_v39 = vpop.f32.mrf.mxu0  ;;  %v840_v40 = vpop.f32.mrf.mxu1 }
 0x140   : > { %v681_v41 = vadd.f32 %v680_v39, %v2472_v37  ;;  %v841_v42 = vadd.f32 %v840_v40, %v2472_v37 }
 0x141   : > { %v682_v43 = vpop.f32.mrf.mxu0  ;;  %v842_v44 = vpop.f32.mrf.mxu1 }
 0x142   : > { %v683_v45 = vadd.f32 %v682_v43, %v2474_v38  ;;  %v843_v46 = vadd.f32 %v842_v44, %v2474_v38  ;;  %v999_v49 = vmax.f32 %v681_v41, 0.0  ;;  %v1063_v50 = vmax.f32 %v841_v42, 0.0 }
 0x143   : > { %v684_v47 = vpop.f32.mrf.mxu0  ;;  %v844_v48 = vpop.f32.mrf.mxu1 }
 0x144   : > { %v1000_v51 = vmax.f32 %v683_v45, 0.0  ;;  %v1064_v52 = vmax.f32 %v843_v46, 0.0  ;;  %v685_v53 = vadd.f32 %v684_v47, %v2472_v37  ;;  %v845_v54 = vadd.f32 %v844_v48, %v2472_v37 }
 0x145   : > { %v686_v55 = vpop.f32.mrf.mxu0  ;;  %v846_v56 = vpop.f32.mrf.mxu1 }
 0x146   : > { %v1818_v57 = vpack.c.bf16 %v1000_v51, %v999_v49  ;;  %v1850_v58 = vpack.c.bf16 %v1064_v52, %v1063_v50  ;;  %v687_v59 = vadd.f32 %v686_v55, %v2474_v38  ;;  %v847_v60 = vadd.f32 %v846_v56, %v2474_v38 }
 0x147   : > { %v690_v61 = vpop.f32.mrf.mxu0  ;;  %v850_v62 = vpop.f32.mrf.mxu1  ;;  %v1001_v1 = vmax.f32 %v685_v53, 0.0  ;;  %v1065_v2 = vmax.f32 %v845_v54, 0.0 }
 0x148   : > { %1511 = vst [vmem:[%s2485_s29] sm:$0xff] %v1818_v57  ;;  %1543 = vst [vmem:[%s2485_s29 + $0x100] sm:$0xff] %v1850_v58  ;;  %v691_v63 = vadd.f32 %v690_v61, %v2472_v37  ;;  %v851_v0 = vadd.f32 %v850_v62, %v2472_v37  ;;  %v1002_v3 = vmax.f32 %v687_v59, 0.0  ;;  %v1066_v4 = vmax.f32 %v847_v60, 0.0 }
 0x149   : > { %v692_v5 = vpop.f32.mrf.mxu0  ;;  %v852_v6 = vpop.f32.mrf.mxu1 }
 0x14a   : > { %v693_v7 = vadd.f32 %v692_v5, %v2474_v38  ;;  %v853_v8 = vadd.f32 %v852_v6, %v2474_v38  ;;  %v1819_v9 = vpack.c.bf16 %v1002_v3, %v1001_v1  ;;  %v1851_v10 = vpack.c.bf16 %v1066_v4, %v1065_v2 }
 0x14b   : > { %v694_v11 = vpop.f32.mrf.mxu0  ;;  %v854_v12 = vpop.f32.mrf.mxu1  ;;  %v1003_v13 = vmax.f32 %v691_v63, 0.0  ;;  %v1067_v14 = vmax.f32 %v851_v0, 0.0 }
 0x14c   : > { %v1004_v15 = vmax.f32 %v693_v7, 0.0  ;;  %v1068_v16 = vmax.f32 %v853_v8, 0.0  ;;  %1512 = vst [vmem:[%s2485_s29 + $0x8] sm:$0xff] %v1819_v9  ;;  %1544 = vst [vmem:[%s2485_s29 + $0x108] sm:$0xff] %v1851_v10  ;;  %v695_v17 = vadd.f32 %v694_v11, %v2472_v37  ;;  %v855_v18 = vadd.f32 %v854_v12, %v2472_v37 }
 0x14d   : > { %v696_v19 = vpop.f32.mrf.mxu0  ;;  %v856_v20 = vpop.f32.mrf.mxu1 }
 0x14e   : > { %v1820_v21 = vpack.c.bf16 %v1004_v15, %v1003_v13  ;;  %v1852_v22 = vpack.c.bf16 %v1068_v16, %v1067_v14  ;;  %v697_v23 = vadd.f32 %v696_v19, %v2474_v38  ;;  %v857_v24 = vadd.f32 %v856_v20, %v2474_v38 }
 0x14f   : > { %v700_v25 = vpop.f32.mrf.mxu0  ;;  %v860_v26 = vpop.f32.mrf.mxu1  ;;  %v1005_v29 = vmax.f32 %v695_v17, 0.0  ;;  %v1069_v30 = vmax.f32 %v855_v18, 0.0 }
 0x150   : > { %1513 = vst [vmem:[%s2485_s29 + $0x10] sm:$0xff] %v1820_v21  ;;  %1545 = vst [vmem:[%s2485_s29 + $0x110] sm:$0xff] %v1852_v22  ;;  %v701_v27 = vadd.f32 %v700_v25, %v2472_v37  ;;  %v861_v28 = vadd.f32 %v860_v26, %v2472_v37  ;;  %v1006_v31 = vmax.f32 %v697_v23, 0.0  ;;  %v1070_v32 = vmax.f32 %v857_v24, 0.0 }
 0x151   : > { %v702_v33 = vpop.f32.mrf.mxu0  ;;  %v862_v34 = vpop.f32.mrf.mxu1 }
 0x152   : > { %v703_v35 = vadd.f32 %v702_v33, %v2474_v38  ;;  %v863_v36 = vadd.f32 %v862_v34, %v2474_v38  ;;  %v1821_v39 = vpack.c.bf16 %v1006_v31, %v1005_v29  ;;  %v1853_v40 = vpack.c.bf16 %v1070_v32, %v1069_v30 }
 0x153   : > { %v704_v41 = vpop.f32.mrf.mxu0  ;;  %v864_v42 = vpop.f32.mrf.mxu1  ;;  %v1007_v43 = vmax.f32 %v701_v27, 0.0  ;;  %v1071_v44 = vmax.f32 %v861_v28, 0.0 }
 0x154   : > { %v1008_v45 = vmax.f32 %v703_v35, 0.0  ;;  %v1072_v46 = vmax.f32 %v863_v36, 0.0  ;;  %1514 = vst [vmem:[%s2485_s29 + $0x18] sm:$0xff] %v1821_v39  ;;  %1546 = vst [vmem:[%s2485_s29 + $0x118] sm:$0xff] %v1853_v40  ;;  %v705_v47 = vadd.f32 %v704_v41, %v2472_v37  ;;  %v865_v48 = vadd.f32 %v864_v42, %v2472_v37 }
 0x155   : > { %v706_v49 = vpop.f32.mrf.mxu0  ;;  %v866_v50 = vpop.f32.mrf.mxu1 }
 0x156   : > { %v1822_v51 = vpack.c.bf16 %v1008_v45, %v1007_v43  ;;  %v1854_v52 = vpack.c.bf16 %v1072_v46, %v1071_v44  ;;  %v707_v53 = vadd.f32 %v706_v49, %v2474_v38  ;;  %v867_v54 = vadd.f32 %v866_v50, %v2474_v38 }
 0x157   : > { %v710_v55 = vpop.f32.mrf.mxu0  ;;  %v870_v56 = vpop.f32.mrf.mxu1  ;;  %v1009_v59 = vmax.f32 %v705_v47, 0.0  ;;  %v1073_v60 = vmax.f32 %v865_v48, 0.0 }
 0x158   : > { %1515 = vst [vmem:[%s2485_s29 + $0x20] sm:$0xff] %v1822_v51  ;;  %1547 = vst [vmem:[%s2485_s29 + $0x120] sm:$0xff] %v1854_v52  ;;  %v711_v57 = vadd.f32 %v710_v55, %v2472_v37  ;;  %v871_v58 = vadd.f32 %v870_v56, %v2472_v37  ;;  %v1010_v61 = vmax.f32 %v707_v53, 0.0  ;;  %v1074_v62 = vmax.f32 %v867_v54, 0.0 }
 0x159   : > { %v712_v63 = vpop.f32.mrf.mxu0  ;;  %v872_v0 = vpop.f32.mrf.mxu1 }
 0x15a   : > { %v713_v1 = vadd.f32 %v712_v63, %v2474_v38  ;;  %v873_v2 = vadd.f32 %v872_v0, %v2474_v38  ;;  %v1823_v3 = vpack.c.bf16 %v1010_v61, %v1009_v59  ;;  %v1855_v4 = vpack.c.bf16 %v1074_v62, %v1073_v60 }
 0x15b   : > { %v714_v5 = vpop.f32.mrf.mxu0  ;;  %v874_v6 = vpop.f32.mrf.mxu1  ;;  %v1011_v7 = vmax.f32 %v711_v57, 0.0  ;;  %v1075_v8 = vmax.f32 %v871_v58, 0.0 }
 0x15c   : > { %v1012_v9 = vmax.f32 %v713_v1, 0.0  ;;  %v1076_v10 = vmax.f32 %v873_v2, 0.0  ;;  %1516 = vst [vmem:[%s2485_s29 + $0x28] sm:$0xff] %v1823_v3  ;;  %1548 = vst [vmem:[%s2485_s29 + $0x128] sm:$0xff] %v1855_v4  ;;  %v715_v11 = vadd.f32 %v714_v5, %v2472_v37  ;;  %v875_v12 = vadd.f32 %v874_v6, %v2472_v37 }
 0x15d   : > { %v716_v13 = vpop.f32.mrf.mxu0  ;;  %v876_v14 = vpop.f32.mrf.mxu1 }
 0x15e   : > { %v1824_v15 = vpack.c.bf16 %v1012_v9, %v1011_v7  ;;  %v1856_v16 = vpack.c.bf16 %v1076_v10, %v1075_v8  ;;  %v717_v17 = vadd.f32 %v716_v13, %v2474_v38  ;;  %v877_v18 = vadd.f32 %v876_v14, %v2474_v38 }
 0x15f   : > { %v720_v19 = vpop.f32.mrf.mxu0  ;;  %v880_v20 = vpop.f32.mrf.mxu1  ;;  %v1013_v23 = vmax.f32 %v715_v11, 0.0  ;;  %v1077_v24 = vmax.f32 %v875_v12, 0.0 }
 0x160   : > { %1517 = vst [vmem:[%s2485_s29 + $0x30] sm:$0xff] %v1824_v15  ;;  %1549 = vst [vmem:[%s2485_s29 + $0x130] sm:$0xff] %v1856_v16  ;;  %v721_v21 = vadd.f32 %v720_v19, %v2472_v37  ;;  %v881_v22 = vadd.f32 %v880_v20, %v2472_v37  ;;  %v1014_v25 = vmax.f32 %v717_v17, 0.0  ;;  %v1078_v26 = vmax.f32 %v877_v18, 0.0 }
 0x161   : > { %v722_v27 = vpop.f32.mrf.mxu0  ;;  %v882_v28 = vpop.f32.mrf.mxu1 }
 0x162   : > { %v723_v29 = vadd.f32 %v722_v27, %v2474_v38  ;;  %v883_v30 = vadd.f32 %v882_v28, %v2474_v38  ;;  %v1825_v31 = vpack.c.bf16 %v1014_v25, %v1013_v23  ;;  %v1857_v32 = vpack.c.bf16 %v1078_v26, %v1077_v24 }
 0x163   : > { %v724_v33 = vpop.f32.mrf.mxu0  ;;  %v884_v34 = vpop.f32.mrf.mxu1  ;;  %v1015_v35 = vmax.f32 %v721_v21, 0.0  ;;  %v1079_v36 = vmax.f32 %v881_v22, 0.0 }
 0x164   : > { %v1016_v39 = vmax.f32 %v723_v29, 0.0  ;;  %v1080_v40 = vmax.f32 %v883_v30, 0.0  ;;  %1518 = vst [vmem:[%s2485_s29 + $0x38] sm:$0xff] %v1825_v31  ;;  %1550 = vst [vmem:[%s2485_s29 + $0x138] sm:$0xff] %v1857_v32  ;;  %v725_v41 = vadd.f32 %v724_v33, %v2472_v37  ;;  %v885_v42 = vadd.f32 %v884_v34, %v2472_v37 }
 0x165   : > { %v726_v43 = vpop.f32.mrf.mxu0  ;;  %v886_v44 = vpop.f32.mrf.mxu1 }
 0x166   : > { %v1826_v45 = vpack.c.bf16 %v1016_v39, %v1015_v35  ;;  %v1858_v46 = vpack.c.bf16 %v1080_v40, %v1079_v36  ;;  %v727_v47 = vadd.f32 %v726_v43, %v2474_v38  ;;  %v887_v48 = vadd.f32 %v886_v44, %v2474_v38 }
 0x167   : > { %v730_v49 = vpop.f32.mrf.mxu0  ;;  %v890_v50 = vpop.f32.mrf.mxu1  ;;  %v1017_v53 = vmax.f32 %v725_v41, 0.0  ;;  %v1081_v54 = vmax.f32 %v885_v42, 0.0 }
 0x168   : > { %1519 = vst [vmem:[%s2485_s29 + $0x40] sm:$0xff] %v1826_v45  ;;  %1551 = vst [vmem:[%s2485_s29 + $0x140] sm:$0xff] %v1858_v46  ;;  %v731_v51 = vadd.f32 %v730_v49, %v2472_v37  ;;  %v891_v52 = vadd.f32 %v890_v50, %v2472_v37  ;;  %v1018_v55 = vmax.f32 %v727_v47, 0.0  ;;  %v1082_v56 = vmax.f32 %v887_v48, 0.0 }
 0x169   : > { %v732_v57 = vpop.f32.mrf.mxu0  ;;  %v892_v58 = vpop.f32.mrf.mxu1 }
 0x16a   : > { %v733_v59 = vadd.f32 %v732_v57, %v2474_v38  ;;  %v893_v60 = vadd.f32 %v892_v58, %v2474_v38  ;;  %v1827_v61 = vpack.c.bf16 %v1018_v55, %v1017_v53  ;;  %v1859_v62 = vpack.c.bf16 %v1082_v56, %v1081_v54 }
 0x16b   : > { %v734_v63 = vpop.f32.mrf.mxu0  ;;  %v894_v0 = vpop.f32.mrf.mxu1  ;;  %v1019_v1 = vmax.f32 %v731_v51, 0.0  ;;  %v1083_v2 = vmax.f32 %v891_v52, 0.0 }
 0x16c   : > { %v1020_v3 = vmax.f32 %v733_v59, 0.0  ;;  %v1084_v4 = vmax.f32 %v893_v60, 0.0  ;;  %1520 = vst [vmem:[%s2485_s29 + $0x48] sm:$0xff] %v1827_v61  ;;  %1552 = vst [vmem:[%s2485_s29 + $0x148] sm:$0xff] %v1859_v62  ;;  %v735_v5 = vadd.f32 %v734_v63, %v2472_v37  ;;  %v895_v6 = vadd.f32 %v894_v0, %v2472_v37 }
 0x16d   : > { %v736_v7 = vpop.f32.mrf.mxu0  ;;  %v896_v8 = vpop.f32.mrf.mxu1 }
 0x16e   : > { %v1828_v9 = vpack.c.bf16 %v1020_v3, %v1019_v1  ;;  %v1860_v10 = vpack.c.bf16 %v1084_v4, %v1083_v2  ;;  %v737_v11 = vadd.f32 %v736_v7, %v2474_v38  ;;  %v897_v12 = vadd.f32 %v896_v8, %v2474_v38 }
 0x16f   : > { %v740_v13 = vpop.f32.mrf.mxu0  ;;  %v900_v14 = vpop.f32.mrf.mxu1  ;;  %v1021_v17 = vmax.f32 %v735_v5, 0.0  ;;  %v1085_v18 = vmax.f32 %v895_v6, 0.0 }
 0x170   : > { %1521 = vst [vmem:[%s2485_s29 + $0x50] sm:$0xff] %v1828_v9  ;;  %1553 = vst [vmem:[%s2485_s29 + $0x150] sm:$0xff] %v1860_v10  ;;  %v741_v15 = vadd.f32 %v740_v13, %v2472_v37  ;;  %v901_v16 = vadd.f32 %v900_v14, %v2472_v37  ;;  %v1022_v19 = vmax.f32 %v737_v11, 0.0  ;;  %v1086_v20 = vmax.f32 %v897_v12, 0.0 }
 0x171   : > { %v742_v21 = vpop.f32.mrf.mxu0  ;;  %v902_v22 = vpop.f32.mrf.mxu1 }
 0x172   : > { %v743_v23 = vadd.f32 %v742_v21, %v2474_v38  ;;  %v903_v24 = vadd.f32 %v902_v22, %v2474_v38  ;;  %v1829_v25 = vpack.c.bf16 %v1022_v19, %v1021_v17  ;;  %v1861_v26 = vpack.c.bf16 %v1086_v20, %v1085_v18 }
 0x173   : > { %v744_v27 = vpop.f32.mrf.mxu0  ;;  %v904_v28 = vpop.f32.mrf.mxu1  ;;  %v1023_v29 = vmax.f32 %v741_v15, 0.0  ;;  %v1087_v30 = vmax.f32 %v901_v16, 0.0 }
 0x174   : > { %v1024_v31 = vmax.f32 %v743_v23, 0.0  ;;  %v1088_v32 = vmax.f32 %v903_v24, 0.0  ;;  %1522 = vst [vmem:[%s2485_s29 + $0x58] sm:$0xff] %v1829_v25  ;;  %1554 = vst [vmem:[%s2485_s29 + $0x158] sm:$0xff] %v1861_v26  ;;  %v745_v33 = vadd.f32 %v744_v27, %v2472_v37  ;;  %v905_v34 = vadd.f32 %v904_v28, %v2472_v37 }
 0x175   : > { %v746_v35 = vpop.f32.mrf.mxu0  ;;  %v906_v36 = vpop.f32.mrf.mxu1 }
 0x176   : > { %v1830_v39 = vpack.c.bf16 %v1024_v31, %v1023_v29  ;;  %v1862_v40 = vpack.c.bf16 %v1088_v32, %v1087_v30  ;;  %v747_v41 = vadd.f32 %v746_v35, %v2474_v38  ;;  %v907_v42 = vadd.f32 %v906_v36, %v2474_v38 }
 0x177   : > { %v750_v43 = vpop.f32.mrf.mxu0  ;;  %v910_v44 = vpop.f32.mrf.mxu1  ;;  %v1025_v47 = vmax.f32 %v745_v33, 0.0  ;;  %v1089_v48 = vmax.f32 %v905_v34, 0.0 }
 0x178   : > { %1523 = vst [vmem:[%s2485_s29 + $0x60] sm:$0xff] %v1830_v39  ;;  %1555 = vst [vmem:[%s2485_s29 + $0x160] sm:$0xff] %v1862_v40  ;;  %v751_v45 = vadd.f32 %v750_v43, %v2472_v37  ;;  %v911_v46 = vadd.f32 %v910_v44, %v2472_v37  ;;  %v1026_v49 = vmax.f32 %v747_v41, 0.0  ;;  %v1090_v50 = vmax.f32 %v907_v42, 0.0 }
 0x179   : > { %v752_v51 = vpop.f32.mrf.mxu0  ;;  %v912_v52 = vpop.f32.mrf.mxu1 }
 0x17a   : > { %v753_v53 = vadd.f32 %v752_v51, %v2474_v38  ;;  %v913_v54 = vadd.f32 %v912_v52, %v2474_v38  ;;  %v1831_v55 = vpack.c.bf16 %v1026_v49, %v1025_v47  ;;  %v1863_v56 = vpack.c.bf16 %v1090_v50, %v1089_v48 }
 0x17b   : > { %v754_v57 = vpop.f32.mrf.mxu0  ;;  %v914_v58 = vpop.f32.mrf.mxu1  ;;  %v1027_v59 = vmax.f32 %v751_v45, 0.0  ;;  %v1091_v60 = vmax.f32 %v911_v46, 0.0 }
 0x17c   : > { %v1028_v61 = vmax.f32 %v753_v53, 0.0  ;;  %v1092_v62 = vmax.f32 %v913_v54, 0.0  ;;  %1524 = vst [vmem:[%s2485_s29 + $0x68] sm:$0xff] %v1831_v55  ;;  %1556 = vst [vmem:[%s2485_s29 + $0x168] sm:$0xff] %v1863_v56  ;;  %v755_v63 = vadd.f32 %v754_v57, %v2472_v37  ;;  %v915_v0 = vadd.f32 %v914_v58, %v2472_v37 }
 0x17d   : > { %v756_v1 = vpop.f32.mrf.mxu0  ;;  %v916_v2 = vpop.f32.mrf.mxu1 }
 0x17e   : > { %v1832_v3 = vpack.c.bf16 %v1028_v61, %v1027_v59  ;;  %v1864_v4 = vpack.c.bf16 %v1092_v62, %v1091_v60  ;;  %v757_v5 = vadd.f32 %v756_v1, %v2474_v38  ;;  %v917_v6 = vadd.f32 %v916_v2, %v2474_v38 }
 0x17f   : > { %v760_v7 = vpop.f32.mrf.mxu0  ;;  %v920_v8 = vpop.f32.mrf.mxu1  ;;  %v1029_v11 = vmax.f32 %v755_v63, 0.0  ;;  %v1093_v12 = vmax.f32 %v915_v0, 0.0 }
 0x180   : > { %1525 = vst [vmem:[%s2485_s29 + $0x70] sm:$0xff] %v1832_v3  ;;  %1557 = vst [vmem:[%s2485_s29 + $0x170] sm:$0xff] %v1864_v4  ;;  %v761_v9 = vadd.f32 %v760_v7, %v2472_v37  ;;  %v921_v10 = vadd.f32 %v920_v8, %v2472_v37  ;;  %v1030_v13 = vmax.f32 %v757_v5, 0.0  ;;  %v1094_v14 = vmax.f32 %v917_v6, 0.0 }
 0x181   : > { %v762_v15 = vpop.f32.mrf.mxu0  ;;  %v922_v16 = vpop.f32.mrf.mxu1 }
 0x182   : > { %v763_v17 = vadd.f32 %v762_v15, %v2474_v38  ;;  %v923_v18 = vadd.f32 %v922_v16, %v2474_v38  ;;  %v1833_v19 = vpack.c.bf16 %v1030_v13, %v1029_v11  ;;  %v1865_v20 = vpack.c.bf16 %v1094_v14, %v1093_v12 }
 0x183   : > { %v764_v21 = vpop.f32.mrf.mxu0  ;;  %v924_v22 = vpop.f32.mrf.mxu1  ;;  %v1031_v23 = vmax.f32 %v761_v9, 0.0  ;;  %v1095_v24 = vmax.f32 %v921_v10, 0.0 }
 0x184   : > { %v1032_v25 = vmax.f32 %v763_v17, 0.0  ;;  %v1096_v26 = vmax.f32 %v923_v18, 0.0  ;;  %1526 = vst [vmem:[%s2485_s29 + $0x78] sm:$0xff] %v1833_v19  ;;  %1558 = vst [vmem:[%s2485_s29 + $0x178] sm:$0xff] %v1865_v20  ;;  %v765_v27 = vadd.f32 %v764_v21, %v2472_v37  ;;  %v925_v28 = vadd.f32 %v924_v22, %v2472_v37 }
 0x185   : > { %v766_v29 = vpop.f32.mrf.mxu0  ;;  %v926_v30 = vpop.f32.mrf.mxu1 }
 0x186   : > { %v1834_v31 = vpack.c.bf16 %v1032_v25, %v1031_v23  ;;  %v1866_v32 = vpack.c.bf16 %v1096_v26, %v1095_v24  ;;  %v767_v33 = vadd.f32 %v766_v29, %v2474_v38  ;;  %v927_v34 = vadd.f32 %v926_v30, %v2474_v38 }
 0x187   : > { %v770_v35 = vpop.f32.mrf.mxu0  ;;  %v930_v36 = vpop.f32.mrf.mxu1  ;;  %v1033_v41 = vmax.f32 %v765_v27, 0.0  ;;  %v1097_v42 = vmax.f32 %v925_v28, 0.0 }
 0x188   : > { %1527 = vst [vmem:[%s2485_s29 + $0x80] sm:$0xff] %v1834_v31  ;;  %1559 = vst [vmem:[%s2485_s29 + $0x180] sm:$0xff] %v1866_v32  ;;  %v771_v39 = vadd.f32 %v770_v35, %v2472_v37  ;;  %v931_v40 = vadd.f32 %v930_v36, %v2472_v37  ;;  %v1034_v43 = vmax.f32 %v767_v33, 0.0  ;;  %v1098_v44 = vmax.f32 %v927_v34, 0.0 }
 0x189   : > { %v772_v45 = vpop.f32.mrf.mxu0  ;;  %v932_v46 = vpop.f32.mrf.mxu1 }
 0x18a   : > { %v773_v47 = vadd.f32 %v772_v45, %v2474_v38  ;;  %v933_v48 = vadd.f32 %v932_v46, %v2474_v38  ;;  %v1835_v49 = vpack.c.bf16 %v1034_v43, %v1033_v41  ;;  %v1867_v50 = vpack.c.bf16 %v1098_v44, %v1097_v42 }
 0x18b   : > { %v774_v51 = vpop.f32.mrf.mxu0  ;;  %v934_v52 = vpop.f32.mrf.mxu1  ;;  %v1035_v53 = vmax.f32 %v771_v39, 0.0  ;;  %v1099_v54 = vmax.f32 %v931_v40, 0.0 }
 0x18c   : > { %v1036_v55 = vmax.f32 %v773_v47, 0.0  ;;  %v1100_v56 = vmax.f32 %v933_v48, 0.0  ;;  %1528 = vst [vmem:[%s2485_s29 + $0x88] sm:$0xff] %v1835_v49  ;;  %1560 = vst [vmem:[%s2485_s29 + $0x188] sm:$0xff] %v1867_v50  ;;  %v775_v57 = vadd.f32 %v774_v51, %v2472_v37  ;;  %v935_v58 = vadd.f32 %v934_v52, %v2472_v37 }
 0x18d   : > { %v776_v59 = vpop.f32.mrf.mxu0  ;;  %v936_v60 = vpop.f32.mrf.mxu1 }
 0x18e   : > { %v1836_v61 = vpack.c.bf16 %v1036_v55, %v1035_v53  ;;  %v1868_v62 = vpack.c.bf16 %v1100_v56, %v1099_v54  ;;  %v777_v63 = vadd.f32 %v776_v59, %v2474_v38  ;;  %v937_v0 = vadd.f32 %v936_v60, %v2474_v38 }
 0x18f   : > { %v780_v1 = vpop.f32.mrf.mxu0  ;;  %v940_v2 = vpop.f32.mrf.mxu1  ;;  %v1037_v5 = vmax.f32 %v775_v57, 0.0  ;;  %v1101_v6 = vmax.f32 %v935_v58, 0.0 }
 0x190   : > { %1529 = vst [vmem:[%s2485_s29 + $0x90] sm:$0xff] %v1836_v61  ;;  %1561 = vst [vmem:[%s2485_s29 + $0x190] sm:$0xff] %v1868_v62  ;;  %v781_v3 = vadd.f32 %v780_v1, %v2472_v37  ;;  %v941_v4 = vadd.f32 %v940_v2, %v2472_v37  ;;  %v1038_v7 = vmax.f32 %v777_v63, 0.0  ;;  %v1102_v8 = vmax.f32 %v937_v0, 0.0 }
 0x191   : > { %v782_v9 = vpop.f32.mrf.mxu0  ;;  %v942_v10 = vpop.f32.mrf.mxu1 }
 0x192   : > { %v783_v11 = vadd.f32 %v782_v9, %v2474_v38  ;;  %v943_v12 = vadd.f32 %v942_v10, %v2474_v38  ;;  %v1837_v13 = vpack.c.bf16 %v1038_v7, %v1037_v5  ;;  %v1869_v14 = vpack.c.bf16 %v1102_v8, %v1101_v6 }
 0x193   : > { %v784_v15 = vpop.f32.mrf.mxu0  ;;  %v944_v16 = vpop.f32.mrf.mxu1  ;;  %v1039_v17 = vmax.f32 %v781_v3, 0.0  ;;  %v1103_v18 = vmax.f32 %v941_v4, 0.0 }
 0x194   : > { %v1040_v19 = vmax.f32 %v783_v11, 0.0  ;;  %v1104_v20 = vmax.f32 %v943_v12, 0.0  ;;  %1530 = vst [vmem:[%s2485_s29 + $0x98] sm:$0xff] %v1837_v13  ;;  %1562 = vst [vmem:[%s2485_s29 + $0x198] sm:$0xff] %v1869_v14  ;;  %v785_v21 = vadd.f32 %v784_v15, %v2472_v37  ;;  %v945_v22 = vadd.f32 %v944_v16, %v2472_v37 }
 0x195   : > { %v786_v23 = vpop.f32.mrf.mxu0  ;;  %v946_v24 = vpop.f32.mrf.mxu1 }
 0x196   : > { %v1838_v25 = vpack.c.bf16 %v1040_v19, %v1039_v17  ;;  %v1870_v26 = vpack.c.bf16 %v1104_v20, %v1103_v18  ;;  %v787_v27 = vadd.f32 %v786_v23, %v2474_v38  ;;  %v947_v28 = vadd.f32 %v946_v24, %v2474_v38 }
 0x197   : > { %v790_v29 = vpop.f32.mrf.mxu0  ;;  %v950_v30 = vpop.f32.mrf.mxu1  ;;  %v1041_v33 = vmax.f32 %v785_v21, 0.0  ;;  %v1105_v34 = vmax.f32 %v945_v22, 0.0 }
 0x198   : > { %1531 = vst [vmem:[%s2485_s29 + $0xa0] sm:$0xff] %v1838_v25  ;;  %1563 = vst [vmem:[%s2485_s29 + $0x1a0] sm:$0xff] %v1870_v26  ;;  %v791_v31 = vadd.f32 %v790_v29, %v2472_v37  ;;  %v951_v32 = vadd.f32 %v950_v30, %v2472_v37  ;;  %v1042_v35 = vmax.f32 %v787_v27, 0.0  ;;  %v1106_v36 = vmax.f32 %v947_v28, 0.0 }
 0x199   : > { %v792_v39 = vpop.f32.mrf.mxu0  ;;  %v952_v40 = vpop.f32.mrf.mxu1 }
 0x19a   : > { %v793_v41 = vadd.f32 %v792_v39, %v2474_v38  ;;  %v953_v42 = vadd.f32 %v952_v40, %v2474_v38  ;;  %v1839_v43 = vpack.c.bf16 %v1042_v35, %v1041_v33  ;;  %v1871_v44 = vpack.c.bf16 %v1106_v36, %v1105_v34 }
 0x19b   : > { %v794_v45 = vpop.f32.mrf.mxu0  ;;  %v954_v46 = vpop.f32.mrf.mxu1  ;;  %v1043_v47 = vmax.f32 %v791_v31, 0.0  ;;  %v1107_v48 = vmax.f32 %v951_v32, 0.0 }
 0x19c   : > { %v1044_v49 = vmax.f32 %v793_v41, 0.0  ;;  %v1108_v50 = vmax.f32 %v953_v42, 0.0  ;;  %1532 = vst [vmem:[%s2485_s29 + $0xa8] sm:$0xff] %v1839_v43  ;;  %1564 = vst [vmem:[%s2485_s29 + $0x1a8] sm:$0xff] %v1871_v44  ;;  %v795_v51 = vadd.f32 %v794_v45, %v2472_v37  ;;  %v955_v52 = vadd.f32 %v954_v46, %v2472_v37 }
 0x19d   : > { %v796_v53 = vpop.f32.mrf.mxu0  ;;  %v956_v54 = vpop.f32.mrf.mxu1 }
 0x19e   : > { %v1840_v55 = vpack.c.bf16 %v1044_v49, %v1043_v47  ;;  %v1872_v56 = vpack.c.bf16 %v1108_v50, %v1107_v48  ;;  %v797_v57 = vadd.f32 %v796_v53, %v2474_v38  ;;  %v957_v58 = vadd.f32 %v956_v54, %v2474_v38 }
 0x19f   : > { %v800_v59 = vpop.f32.mrf.mxu0  ;;  %v960_v60 = vpop.f32.mrf.mxu1  ;;  %v1045_v63 = vmax.f32 %v795_v51, 0.0  ;;  %v1109_v0 = vmax.f32 %v955_v52, 0.0 }
 0x1a0   : > { %1533 = vst [vmem:[%s2485_s29 + $0xb0] sm:$0xff] %v1840_v55  ;;  %1565 = vst [vmem:[%s2485_s29 + $0x1b0] sm:$0xff] %v1872_v56  ;;  %v801_v61 = vadd.f32 %v800_v59, %v2472_v37  ;;  %v961_v62 = vadd.f32 %v960_v60, %v2472_v37  ;;  %v1046_v1 = vmax.f32 %v797_v57, 0.0  ;;  %v1110_v2 = vmax.f32 %v957_v58, 0.0 }
 0x1a1   : > { %v802_v3 = vpop.f32.mrf.mxu0  ;;  %v962_v4 = vpop.f32.mrf.mxu1 }
 0x1a2   : > { %v803_v5 = vadd.f32 %v802_v3, %v2474_v38  ;;  %v963_v6 = vadd.f32 %v962_v4, %v2474_v38  ;;  %v1841_v7 = vpack.c.bf16 %v1046_v1, %v1045_v63  ;;  %v1873_v8 = vpack.c.bf16 %v1110_v2, %v1109_v0 }
 0x1a3   : > { %v804_v9 = vpop.f32.mrf.mxu0  ;;  %v964_v10 = vpop.f32.mrf.mxu1  ;;  %v1047_v11 = vmax.f32 %v801_v61, 0.0  ;;  %v1111_v12 = vmax.f32 %v961_v62, 0.0 }
 0x1a4   : > { %v1048_v13 = vmax.f32 %v803_v5, 0.0  ;;  %v1112_v14 = vmax.f32 %v963_v6, 0.0  ;;  %1534 = vst [vmem:[%s2485_s29 + $0xb8] sm:$0xff] %v1841_v7  ;;  %1566 = vst [vmem:[%s2485_s29 + $0x1b8] sm:$0xff] %v1873_v8  ;;  %v805_v15 = vadd.f32 %v804_v9, %v2472_v37  ;;  %v965_v16 = vadd.f32 %v964_v10, %v2472_v37 }
 0x1a5   : > { %v806_v17 = vpop.f32.mrf.mxu0  ;;  %v966_v18 = vpop.f32.mrf.mxu1 }
 0x1a6   : > { %v1842_v19 = vpack.c.bf16 %v1048_v13, %v1047_v11  ;;  %v1874_v20 = vpack.c.bf16 %v1112_v14, %v1111_v12  ;;  %v807_v21 = vadd.f32 %v806_v17, %v2474_v38  ;;  %v967_v22 = vadd.f32 %v966_v18, %v2474_v38 }
 0x1a7   : > { %v810_v23 = vpop.f32.mrf.mxu0  ;;  %v970_v24 = vpop.f32.mrf.mxu1  ;;  %v1049_v27 = vmax.f32 %v805_v15, 0.0  ;;  %v1113_v28 = vmax.f32 %v965_v16, 0.0 }
 0x1a8   : > { %1535 = vst [vmem:[%s2485_s29 + $0xc0] sm:$0xff] %v1842_v19  ;;  %1567 = vst [vmem:[%s2485_s29 + $0x1c0] sm:$0xff] %v1874_v20  ;;  %v811_v25 = vadd.f32 %v810_v23, %v2472_v37  ;;  %v971_v26 = vadd.f32 %v970_v24, %v2472_v37  ;;  %v1050_v29 = vmax.f32 %v807_v21, 0.0  ;;  %v1114_v30 = vmax.f32 %v967_v22, 0.0 }
 0x1a9   : > { %v812_v31 = vpop.f32.mrf.mxu0  ;;  %v972_v32 = vpop.f32.mrf.mxu1 }
 0x1aa   : > { %v813_v33 = vadd.f32 %v812_v31, %v2474_v38  ;;  %v973_v34 = vadd.f32 %v972_v32, %v2474_v38  ;;  %v1843_v35 = vpack.c.bf16 %v1050_v29, %v1049_v27  ;;  %v1875_v36 = vpack.c.bf16 %v1114_v30, %v1113_v28 }
 0x1ab   : > { %v814_v39 = vpop.f32.mrf.mxu0  ;;  %v974_v40 = vpop.f32.mrf.mxu1  ;;  %v1051_v41 = vmax.f32 %v811_v25, 0.0  ;;  %v1115_v42 = vmax.f32 %v971_v26, 0.0 }
 0x1ac   : > { %v1052_v43 = vmax.f32 %v813_v33, 0.0  ;;  %v1116_v44 = vmax.f32 %v973_v34, 0.0  ;;  %1536 = vst [vmem:[%s2485_s29 + $0xc8] sm:$0xff] %v1843_v35  ;;  %1568 = vst [vmem:[%s2485_s29 + $0x1c8] sm:$0xff] %v1875_v36  ;;  %v815_v45 = vadd.f32 %v814_v39, %v2472_v37  ;;  %v975_v46 = vadd.f32 %v974_v40, %v2472_v37 }
 0x1ad   : > { %v816_v47 = vpop.f32.mrf.mxu0  ;;  %v976_v48 = vpop.f32.mrf.mxu1 }
 0x1ae   : > { %v1844_v49 = vpack.c.bf16 %v1052_v43, %v1051_v41  ;;  %v1876_v50 = vpack.c.bf16 %v1116_v44, %v1115_v42  ;;  %v817_v51 = vadd.f32 %v816_v47, %v2474_v38  ;;  %v977_v52 = vadd.f32 %v976_v48, %v2474_v38 }
 0x1af   : > { %v820_v53 = vpop.f32.mrf.mxu0  ;;  %v980_v54 = vpop.f32.mrf.mxu1  ;;  %v1053_v57 = vmax.f32 %v815_v45, 0.0  ;;  %v1117_v58 = vmax.f32 %v975_v46, 0.0 }
 0x1b0   : > { %1537 = vst [vmem:[%s2485_s29 + $0xd0] sm:$0xff] %v1844_v49  ;;  %1569 = vst [vmem:[%s2485_s29 + $0x1d0] sm:$0xff] %v1876_v50  ;;  %v821_v55 = vadd.f32 %v820_v53, %v2472_v37  ;;  %v981_v56 = vadd.f32 %v980_v54, %v2472_v37  ;;  %v1054_v59 = vmax.f32 %v817_v51, 0.0  ;;  %v1118_v60 = vmax.f32 %v977_v52, 0.0 }
 0x1b1   : > { %v822_v61 = vpop.f32.mrf.mxu0  ;;  %v982_v62 = vpop.f32.mrf.mxu1 }
 0x1b2   : > { %v823_v63 = vadd.f32 %v822_v61, %v2474_v38  ;;  %v983_v0 = vadd.f32 %v982_v62, %v2474_v38  ;;  %v1845_v1 = vpack.c.bf16 %v1054_v59, %v1053_v57  ;;  %v1877_v2 = vpack.c.bf16 %v1118_v60, %v1117_v58 }
 0x1b3   : > { %v824_v3 = vpop.f32.mrf.mxu0  ;;  %v984_v4 = vpop.f32.mrf.mxu1  ;;  %v1055_v5 = vmax.f32 %v821_v55, 0.0  ;;  %v1119_v6 = vmax.f32 %v981_v56, 0.0 }
 0x1b4   : > { %v1056_v7 = vmax.f32 %v823_v63, 0.0  ;;  %v1120_v8 = vmax.f32 %v983_v0, 0.0  ;;  %1538 = vst [vmem:[%s2485_s29 + $0xd8] sm:$0xff] %v1845_v1  ;;  %1570 = vst [vmem:[%s2485_s29 + $0x1d8] sm:$0xff] %v1877_v2  ;;  %v825_v9 = vadd.f32 %v824_v3, %v2472_v37  ;;  %v985_v10 = vadd.f32 %v984_v4, %v2472_v37 }
 0x1b5   : > { %v826_v11 = vpop.f32.mrf.mxu0  ;;  %v986_v12 = vpop.f32.mrf.mxu1 }
 0x1b6   : > { %v1846_v13 = vpack.c.bf16 %v1056_v7, %v1055_v5  ;;  %v1878_v14 = vpack.c.bf16 %v1120_v8, %v1119_v6  ;;  %v827_v15 = vadd.f32 %v826_v11, %v2474_v38  ;;  %v987_v16 = vadd.f32 %v986_v12, %v2474_v38 }
 0x1b7   : > { %v830_v17 = vpop.f32.mrf.mxu0  ;;  %v990_v18 = vpop.f32.mrf.mxu1  ;;  %v1057_v21 = vmax.f32 %v825_v9, 0.0  ;;  %v1121_v22 = vmax.f32 %v985_v10, 0.0 }
 0x1b8   : > { %1539 = vst [vmem:[%s2485_s29 + $0xe0] sm:$0xff] %v1846_v13  ;;  %1571 = vst [vmem:[%s2485_s29 + $0x1e0] sm:$0xff] %v1878_v14  ;;  %v831_v19 = vadd.f32 %v830_v17, %v2472_v37  ;;  %v991_v20 = vadd.f32 %v990_v18, %v2472_v37  ;;  %v1058_v23 = vmax.f32 %v827_v15, 0.0  ;;  %v1122_v24 = vmax.f32 %v987_v16, 0.0 }
 0x1b9   : > { %v832_v25 = vpop.f32.mrf.mxu0  ;;  %v992_v26 = vpop.f32.mrf.mxu1 }
 0x1ba   : > { %v833_v27 = vadd.f32 %v832_v25, %v2474_v38  ;;  %v993_v28 = vadd.f32 %v992_v26, %v2474_v38  ;;  %v1847_v29 = vpack.c.bf16 %v1058_v23, %v1057_v21  ;;  %v1879_v30 = vpack.c.bf16 %v1122_v24, %v1121_v22 }
 0x1bb   : > { %v834_v31 = vpop.f32.mrf.mxu0  ;;  %v994_v32 = vpop.f32.mrf.mxu1  ;;  %v1059_v33 = vmax.f32 %v831_v19, 0.0  ;;  %v1123_v34 = vmax.f32 %v991_v20, 0.0 }
 0x1bc   : > { %v1060_v35 = vmax.f32 %v833_v27, 0.0  ;;  %v1124_v36 = vmax.f32 %v993_v28, 0.0  ;;  %1540 = vst [vmem:[%s2485_s29 + $0xe8] sm:$0xff] %v1847_v29  ;;  %1572 = vst [vmem:[%s2485_s29 + $0x1e8] sm:$0xff] %v1879_v30  ;;  %v835_v39 = vadd.f32 %v834_v31, %v2472_v37  ;;  %v995_v40 = vadd.f32 %v994_v32, %v2472_v37 }
 0x1bd   : > { %v836_v41 = vpop.f32.mrf.mxu0  ;;  %v996_v42 = vpop.f32.mrf.mxu1 }
 0x1be   : > { %v1848_v43 = vpack.c.bf16 %v1060_v35, %v1059_v33  ;;  %v1880_v44 = vpack.c.bf16 %v1124_v36, %v1123_v34  ;;  %v837_v45 = vadd.f32 %v836_v41, %v2474_v38  ;;  %v997_v46 = vadd.f32 %v996_v42, %v2474_v38 }
 0x1bf   : > { %v1061_v47 = vmax.f32 %v835_v39, 0.0  ;;  %v1125_v48 = vmax.f32 %v995_v40, 0.0 }
 0x1c0   : > { %1541 = vst [vmem:[%s2485_s29 + $0xf0] sm:$0xff] %v1848_v43  ;;  %1573 = vst [vmem:[%s2485_s29 + $0x1f0] sm:$0xff] %v1880_v44  ;;  %v1062_v49 = vmax.f32 %v837_v45, 0.0  ;;  %v1126_v37 = vmax.f32 %v997_v46, 0.0 }
 0x1c2   : > { %v1849_v38 = vpack.c.bf16 %v1062_v49, %v1061_v47  ;;  %v1881_v50 = vpack.c.bf16 %v1126_v37, %v1125_v48 }
 0x1c4   : > { %1542 = vst [vmem:[%s2485_s29 + $0xf8] sm:$0xff] %v1849_v38  ;;  %1574 = vst [vmem:[%s2485_s29 + $0x1f8] sm:$0xff] %v1881_v50 }
 0x1c5   : > { %2110 = shalt.err (!%p2107_p5)
}
 0x1c6   : > { %s2111_s26 = scalar_lea.hbm %s2674_s7, 8192  ;;  %s2115_s20 = scalar_lea.hbm %s2729_s3, 16384 }
 0x1c7   : > { %p2112_p7 = scmp.ne.s32.totalorder %s2674_s7, %s2111_s26  ;;  %p2116_p9 = scmp.lt.s32.totalorder %s2674_s7, %s2729_s3 }
 0x1c8   : > { %p2117_p11 = scmp.lt.s32.totalorder %s2115_s20, %s2111_s26 }
 0x1c9   : > { %p2113_p6 = pnand %p2112_p7, %p2299_p13 }
 0x1ca   : > { %p2118_p12 = por %p2117_p11, %p2116_p9 }
 0x1cb   : > { %p2114_p4 = pneg %p2113_p6 }
 0x1cd   : > { %p2119_p1 = pnand %p2118_p12, %p2114_p4 }
 0x1cf   : > { %2122 = shalt.err (!%p2119_p1)
}
 0x1d0   : > { %s2190_s29 = smov 128   ;;  %s2191_s4 = smov 8  }
 0x1d1   : > { %1922 = dma.vmem_to_hbm [thread:$0]  (%p2299_p13), %s2676_s21, 8192, %s2674_s7, %s1576_s15, %s2190_s29, %s2190_s29, %s2191_s4  }
 0x1d2 PF: > { %s1607_s5 = sand.u32 1, %s2161_s12   ;;  %p2741_p8 = scmp.ne.s32.totalorder %s2734_s23, 0 }
 0x1d3   : > { %p2742_p10 = scmp.ge.s32.totalorder %s2181_s17, 2  ;;  %s1608_s6 = scalar_lea.sflag [#allocation4], %s1607_s5 }
 0x1d5   : > { %p1933_p0 = pnand %p2742_p10, %p2741_p8 }
 0x1d7   : > { %p1934_p2 = pneg %p1933_p0 }
 0x1d9   : > { %2156 = dma.done.wait (%p1934_p2), %s1608_s6, 8192  }
 0x1da   : > { %2158 = vsyncadd (%p1934_p2), %s1608_s6, 4294959104  ;;  %s20_s17 = sadd.s32 1, %s2181_s17   ;;  %s2743_s12 = smov %s2165_s13 }
 0x1db   : > { %p17_p3 = scmp.ge.s32.totalorder %s20_s17, 4   ;;  %s2744_s13 = smov %s2169_s14 }
 0x1dc   : > { %s2745_s14 = smov %s2308_s19  ;;  %s2746_s15 = smov %s2177_s16 }
 0x1dd   : > { %s2747_s16 = smov %s2749_s28  ;;  %19 = sbr.rel (!%p17_p3) target bundleno = 7 (0x7), region = 85 }
 0x1e2   :  { %1613 = vsyncpa [#allocation3], 1 }
 0x1e3   :  { %1615 = vsyncpa [#allocation3 + $0x1], 1 }
 0x1e4   :  { %1616 = vsyncpa [#allocation6], 1 }
 0x1e5   :  { %1617 = vsyncpa [#allocation4], 1 }
 0x1e6   :  { %1619 = vsyncpa [#allocation4 + $0x1], 1 }

</bundles_post_ra>
